<compile_context>
chip_gen: v7x
topology: tpu7x:2x2x1
jax: 0.10.0
libtpu: 0.0.40
codegen_flags: <defaults>
</compile_context>

<pallas_src>
import math

import jax
import jax.numpy as jnp
from jax.experimental import pallas as pl
from jax.experimental.pallas import tpu as pltpu

LANES = 128      # TPU lane width
SUBLANES = 8     # f32 sublane tile


def _round_up(x, m):
    return ((x + m - 1) // m) * m


# ----------------------------------------------------------------------------
# Fused Pallas kernel (synthetic backbone + lm head + both multi-task heads)
# ----------------------------------------------------------------------------
def _make_fused_kernel(b_blk, T, sub):
    """Build the kernel body for a (b_blk * T)-row block of frames."""
    inv_t = 1.0 / float(T)

    def kernel(frames_ref, wenc_ref, benc_ref, wlm_ref, blm_ref,
               wproj_ref, bproj_ref, wcls_ref, bcls_ref,
               lm_ref, heads_ref):
        # --- synthetic wav2vec2 backbone: frame -> linear -> tanh ----------
        # frames arrive f32 (keeps the (8,128) row tile simple); cast to bf16
        # so the MXU runs its fast bf16 path, accumulate in f32.
        frames_bf = frames_ref[...].astype(jnp.bfloat16)
        pre = jnp.dot(frames_bf, wenc_ref[...],
                      preferred_element_type=jnp.float32) + benc_ref[...]
        hid = jnp.tanh(pre)                       # f32 tanh (v5e has no bf16 EUP)
        hid_bf = hid.astype(jnp.bfloat16)

        # --- lm head: lane-padded to 128 -> unmasked dense stores ----------
        lm_ref[...] = (jnp.dot(hid_bf, wlm_ref[...],
                               preferred_element_type=jnp.float32)
                       + blm_ref[...])

        # --- multi-task heads ----------------------------------------------
        # Time-mean commutes with the linear projector, so reduce first.
        # The reduction is a sublane reshape-sum (XLU), NOT a matmul, so it
        # overlaps with the MXU work above instead of serializing behind it.
        feat_mean = hid.reshape(b_blk, T, hid.shape[-1]).sum(axis=1) * inv_t
        proj = (jnp.dot(feat_mean.astype(jnp.bfloat16), wproj_ref[...],
                        preferred_element_type=jnp.float32) + bproj_ref[...])
        heads = (jnp.dot(proj.astype(jnp.bfloat16), wcls_ref[...],
                         preferred_element_type=jnp.float32) + bcls_ref[...])
        if b_blk < sub:
            # Pad the sublane dim so this grid step stores one fully dense
            # (sub, Cp) block it owns exclusively (parallel-grid safe).
            heads = jnp.concatenate(
                [heads, jnp.zeros((sub - b_blk, heads.shape[-1]), heads.dtype)],
                axis=0)
        heads_ref[...] = heads

    return kernel


# ----------------------------------------------------------------------------
# Parameter packing: fuse the two head branches, lane-pad, cast MXU weights bf16
# ----------------------------------------------------------------------------
def pack_params(params, frame_size, hidden, proj_hidden, num_accent):
    F, H, P, A = frame_size, hidden, proj_hidden, num_accent
    V = params["w_lm"].shape[1]
    Fp = _round_up(F, LANES)
    Hp = _round_up(H, LANES)
    Vp = _round_up(V, LANES)
    Pp = _round_up(2 * P, LANES)
    Cp = _round_up(A + 2, LANES)

    w_enc = jnp.zeros((Fp, Hp), jnp.float32).at[:F, :H].set(params["w_enc"])
    b_enc = jnp.zeros((1, Hp), jnp.float32).at[:, :H].set(params["b_enc"])
    w_lm = jnp.zeros((Hp, Vp), jnp.float32).at[:H, :V].set(params["w_lm"])
    b_lm = jnp.zeros((1, Vp), jnp.float32).at[:, :V].set(params["b_lm"])
    # [accent_projector | gender_projector], lane-padded
    w_proj = (jnp.zeros((Hp, Pp), jnp.float32)
              .at[:H, :P].set(params["w_ap"])
              .at[:H, P:2 * P].set(params["w_gp"]))
    b_proj = (jnp.zeros((1, Pp), jnp.float32)
              .at[:, :P].set(params["b_ap"])
              .at[:, P:2 * P].set(params["b_gp"]))
    # block-diagonal [accent_classifier ; gender_classifier], lane-padded
    w_cls = (jnp.zeros((Pp, Cp), jnp.float32)
             .at[:P, :A].set(params["w_ac"])
             .at[P:2 * P, A:A + 2].set(params["w_gc"]))
    b_cls = (jnp.zeros((1, Cp), jnp.float32)
             .at[:, :A].set(params["b_ac"])
             .at[:, A:A + 2].set(params["b_gc"]))

    return dict(
        w_enc=w_enc.astype(jnp.bfloat16), b_enc=b_enc,
        w_lm=w_lm.astype(jnp.bfloat16), b_lm=b_lm,
        w_proj=w_proj.astype(jnp.bfloat16), b_proj=b_proj,
        w_cls=w_cls.astype(jnp.bfloat16), b_cls=b_cls,
        F=F, Fp=Fp, H=H, Hp=Hp, V=V, Vp=Vp, P=P, Pp=Pp, A=A, Cp=Cp)


# ----------------------------------------------------------------------------
# Batch blocking heuristic
# ----------------------------------------------------------------------------
def _batch_block(B, T, target_rows=1024):
    """Pick b_blk (divisor of B) such that:
       - b_blk*T satisfies the (8,128) sublane rule (or b_blk == B),
       - the row tile stays <= target_rows when possible,
       - at least 2 grid steps remain when possible (v7x has 2 TensorCores),
       - otherwise the tile is as large as possible (amortize per-step ~0.35us).
    """
    candidates = []
    for d in range(1, B + 1):
        if B % d:
            continue
        rows = d * T
        if rows % SUBLANES != 0 and d != B:
            continue
        candidates.append(d)
    if not candidates:
        return B

    def score(d):
        rows = d * T
        return (rows <= target_rows, (B // d) >= 2, rows)

    return max(candidates, key=score)


# ----------------------------------------------------------------------------
# Forward wrapper: mirrors MultiTaskWav2Vec2.forward(waveform, lm_labels=None)
# ----------------------------------------------------------------------------
def multitask_wav2vec2_forward(waveform, packed, frame_size, *, target_rows=1024):
    B, L = waveform.shape
    F, Fp, Hp = packed["F"], packed["Fp"], packed["Hp"]
    V, Vp, Pp, A, Cp = packed["V"], packed["Vp"], packed["Pp"], packed["A"], packed["Cp"]
    T = L // frame_size

    b_blk = _batch_block(B, T, target_rows)
    num_blocks = B // b_blk
    rows = b_blk * T
    sub = max(SUBLANES, _round_up(b_blk, SUBLANES))

    # Flatten (batch, time) into row-dense frames and zero-pad the K dim to
    # 128 so the first matmul feeds a full MXU column (padding is exact).
    frames = waveform[:, :T * frame_size].reshape(B * T, frame_size)
    frames = jnp.zeros((B * T, Fp), jnp.float32).at[:, :F].set(frames)

    weights = [packed["w_enc"], packed["b_enc"], packed["w_lm"], packed["b_lm"],
               packed["w_proj"], packed["b_proj"], packed["w_cls"], packed["b_cls"]]

    kernel = _make_fused_kernel(b_blk, T, sub)

    flops = (2 * B * T * Fp * Hp + 2 * B * T * Hp * Vp
             + 2 * B * Hp * Pp + 2 * B * Pp * Cp)
    bytes_accessed = (int(frames.size) * 4
                      + sum(int(w.size) * w.dtype.itemsize for w in weights)
                      + B * T * Vp * 4 + num_blocks * sub * Cp * 4)
    cost = pl.CostEstimate(flops=int(flops), transcendentals=int(B * T * Hp),
                           bytes_accessed=int(bytes_accessed))

    def _weight_spec(arr, single_buffer):
        nd = arr.ndim
        idx = lambda i, _nd=nd: (0,) * _nd          # grid-invariant block
        if single_buffer:
            # single-buffered: no 2x VMEM, no per-step re-DMA of weights
            return pl.BlockSpec(arr.shape, idx, pipeline_mode=pl.Buffered(1))
        return pl.BlockSpec(arr.shape, idx)

    def _call(single_buffer_weights):
        out = pl.pallas_call(
            kernel,
            out_shape=(
                jax.ShapeDtypeStruct((B * T, Vp), jnp.float32),
                jax.ShapeDtypeStruct((num_blocks * sub, Cp), jnp.float32),
            ),
            grid_spec=pltpu.PrefetchScalarGridSpec(
                num_scalar_prefetch=0,
                grid=(num_blocks,),
                in_specs=[pl.BlockSpec((rows, Fp), lambda i: (i, 0))]
                         + [_weight_spec(w, single_buffer_weights) for w in weights],
                out_specs=[
                    pl.BlockSpec((rows, Vp), lambda i: (i, 0)),
                    pl.BlockSpec((sub, Cp), lambda i: (i, 0)),
                ],
            ),
            compiler_params=pltpu.CompilerParams(
                dimension_semantics=("parallel",),
                # raise the scoped-VMEM cap so big row tiles are usable on
                # v5e/v6e (128 MiB physical); still <= v7x's 64 MiB physical.
                vmem_limit_bytes=64 * 1024 * 1024),
            cost_estimate=cost,
        )(frames, *weights)
        return out

    try:
        lm_pad, heads_pad = _call(True)
        jax.block_until_ready((lm_pad, heads_pad))
    except Exception:
        # Portability guard: if this jax build rejects pipeline_mode=Buffered(1),
        # fall back to default (double-buffered) weight specs.
        lm_pad, heads_pad = _call(False)

    lm_logits = lm_pad.reshape(B, T, Vp)[:, :, :V]
    heads = heads_pad.reshape(num_blocks, sub, Cp)[:, :b_blk, :].reshape(B, Cp)
    accent_logits = heads[:, :A]
    gender_logits = heads[:, A:A + 2]
    ctc_loss = None  # lm_labels is None -> no CTC loss, as in the reference
    return ctc_loss, lm_logits, accent_logits, gender_logits


# ----------------------------------------------------------------------------
# Deterministic parameter init (PyTorch nn.Linear style U(-1/sqrt(in), 1/sqrt(in)))
# ----------------------------------------------------------------------------
def _linear_params(key, fan_in, fan_out):
    bound = 1.0 / math.sqrt(fan_in)
    kw, kb = jax.random.split(key)
    w = jax.random.uniform(kw, (fan_in, fan_out), jnp.float32, -bound, bound)
    b = jax.random.uniform(kb, (1, fan_out), jnp.float32, -bound, bound)
    return w, b


def init_params(key, frame_size, hidden, proj_hidden, num_accent, vocab):
    ks = jax.random.split(key, 6)
    w_enc, b_enc = _linear_params(ks[0], frame_size, hidden)     # synthetic backbone
    w_lm, b_lm = _linear_params(ks[1], hidden, vocab)            # synthetic lm head
    w_ap, b_ap = _linear_params(ks[2], hidden, proj_hidden)      # accent_projector
    w_ac, b_ac = _linear_params(ks[3], proj_hidden, num_accent)  # accent_classifier
    w_gp, b_gp = _linear_params(ks[4], hidden, proj_hidden)      # gender_projector
    w_gc, b_gc = _linear_params(ks[5], proj_hidden, 2)           # gender_classifier
    return dict(w_enc=w_enc, b_enc=b_enc, w_lm=w_lm, b_lm=b_lm,
                w_ap=w_ap, b_ap=b_ap, w_ac=w_ac, b_ac=b_ac,
                w_gp=w_gp, b_gp=b_gp, w_gc=w_gc, b_gc=b_gc)


# ----------------------------------------------------------------------------
if __name__ == "__main__":
    # Small shapes consistent with the module:
    #   batch=2, waveform length=128, frame=16 -> T=8 time steps,
    #   backbone_hidden_size=32, projection_hidden_size=16,
    #   num_accent_class=4, vocab (lm logits)=12.
    B, L = 2, 128
    FRAME = 16
    HIDDEN = 32
    PROJ = 16
    N_ACCENT = 4
    VOCAB = 12

    key = jax.random.PRNGKey(0)
    k_wave, k_params = jax.random.split(key)
    waveform = jax.random.normal(k_wave, (B, L), dtype=jnp.float32)
    params = init_params(k_params, FRAME, HIDDEN, PROJ, N_ACCENT, VOCAB)
    packed = pack_params(params, FRAME, HIDDEN, PROJ, N_ACCENT)

    ctc_loss, lm_logits, accent_logits, gender_logits = \
        multitask_wav2vec2_forward(waveform, packed, FRAME)
    jax.block_until_ready((lm_logits, accent_logits, gender_logits))

    assert ctc_loss is None
    assert lm_logits.shape == (B, L // FRAME, VOCAB)
    assert accent_logits.shape == (B, N_ACCENT)
    assert gender_logits.shape == (B, 2)

    # Precision-matched pure-JAX reference (same bf16-operand / f32-accumulate
    # policy as the kernel's MXU path).
    bf16 = jnp.bfloat16
    T = L // FRAME
    frames_bf = waveform.reshape(B, T, FRAME).astype(bf16)
    hid = jnp.tanh(
        jnp.einsum("btf,fh->bth", frames_bf, params["w_enc"].astype(bf16),
                   preferred_element_type=jnp.float32) + params["b_enc"])
    hid_bf = hid.astype(bf16)
    lm_ref = jnp.einsum("bth,hv->btv", hid_bf, params["w_lm"].astype(bf16),
                        preferred_element_type=jnp.float32) + params["b_lm"]
    feat_mean = hid.mean(axis=1).astype(bf16)
    acc_p = (jnp.dot(feat_mean, params["w_ap"].astype(bf16),
                     preferred_element_type=jnp.float32) + params["b_ap"]).astype(bf16)
    acc_ref = jnp.dot(acc_p, params["w_ac"].astype(bf16),
                      preferred_element_type=jnp.float32) + params["b_ac"]
    gen_p = (jnp.dot(feat_mean, params["w_gp"].astype(bf16),
                     preferred_element_type=jnp.float32) + params["b_gp"]).astype(bf16)
    gen_ref = jnp.dot(gen_p, params["w_gc"].astype(bf16),
                      preferred_element_type=jnp.float32) + params["b_gc"]

    assert jnp.allclose(lm_logits, lm_ref, atol=2e-3, rtol=2e-3)
    assert jnp.allclose(accent_logits, acc_ref, atol=2e-3, rtol=2e-3)
    assert jnp.allclose(gender_logits, gen_ref, atol=2e-3, rtol=2e-3)

    # Sanity check against the full-f32 math of the PyTorch module (bf16 MXU
    # operands keep the error to a few 1e-3 at these sizes).
    feat32 = jnp.tanh(waveform.reshape(B, T, FRAME) @ params["w_enc"] + params["b_enc"])
    lm32 = feat32 @ params["w_lm"] + params["b_lm"]
    acc32 = (feat32 @ params["w_ap"] + params["b_ap"]).mean(axis=1) \
        @ params["w_ac"] + params["b_ac"]
    gen32 = (feat32 @ params["w_gp"] + params["b_gp"]).mean(axis=1) \
        @ params["w_gc"] + params["b_gc"]
    assert jnp.allclose(lm_logits, lm32, atol=5e-2)
    assert jnp.allclose(accent_logits, acc32, atol=5e-2)
    assert jnp.allclose(gender_logits, gen32, atol=5e-2)

    print("KERNEL_OK")
</pallas_src>

<mosaic_0001>
module attributes {stable_mosaic.version = 11 : i64} {
  func.func @kernel(%arg0: i32, %arg1: memref<8x128xf32, #tpu.memory_space<vmem>>, %arg2: memref<128x128xbf16, #tpu.memory_space<vmem>>, %arg3: memref<1x128xf32, #tpu.memory_space<vmem>>, %arg4: memref<128x128xbf16, #tpu.memory_space<vmem>>, %arg5: memref<1x128xf32, #tpu.memory_space<vmem>>, %arg6: memref<128x128xbf16, #tpu.memory_space<vmem>>, %arg7: memref<1x128xf32, #tpu.memory_space<vmem>>, %arg8: memref<128x128xbf16, #tpu.memory_space<vmem>>, %arg9: memref<1x128xf32, #tpu.memory_space<vmem>>, %arg10: memref<8x128xf32, #tpu.memory_space<vmem>>, %arg11: memref<8x128xf32, #tpu.memory_space<vmem>>) attributes {dimension_semantics = [#tpu.dimension_semantics<parallel>], iteration_bounds = array<i64: 2>, scalar_prefetch = 0 : i64, scratch_operands = 0 : i64, tpu.core_type = #tpu.core_type<tc>, window_params = [{transform_indices = @transform_0, window_bounds = array<i64: 8, 128>}, {pipeline_mode = #tpu.pipeline_mode<synchronous>, transform_indices = @transform_1, window_bounds = array<i64: 128, 128>}, {pipeline_mode = #tpu.pipeline_mode<synchronous>, transform_indices = @transform_2, window_bounds = array<i64: 1, 128>}, {pipeline_mode = #tpu.pipeline_mode<synchronous>, transform_indices = @transform_3, window_bounds = array<i64: 128, 128>}, {pipeline_mode = #tpu.pipeline_mode<synchronous>, transform_indices = @transform_4, window_bounds = array<i64: 1, 128>}, {pipeline_mode = #tpu.pipeline_mode<synchronous>, transform_indices = @transform_5, window_bounds = array<i64: 128, 128>}, {pipeline_mode = #tpu.pipeline_mode<synchronous>, transform_indices = @transform_6, window_bounds = array<i64: 1, 128>}, {pipeline_mode = #tpu.pipeline_mode<synchronous>, transform_indices = @transform_7, window_bounds = array<i64: 128, 128>}, {pipeline_mode = #tpu.pipeline_mode<synchronous>, transform_indices = @transform_8, window_bounds = array<i64: 1, 128>}, {transform_indices = @transform_9, window_bounds = array<i64: 8, 128>}, {transform_indices = @transform_10, window_bounds = array<i64: 8, 128>}]} {
    %c0 = arith.constant 0 : index
    %c0_0 = arith.constant 0 : index
    %0 = vector.load %arg1[%c0, %c0_0] : memref<8x128xf32, #tpu.memory_space<vmem>>, vector<8x128xf32>
    %1 = arith.truncf %0 : vector<8x128xf32> to vector<8x128xbf16>
    %c0_1 = arith.constant 0 : index
    %c0_2 = arith.constant 0 : index
    %2 = vector.load %arg2[%c0_1, %c0_2] : memref<128x128xbf16, #tpu.memory_space<vmem>>, vector<128x128xbf16>
    %cst = arith.constant dense<0.000000e+00> : vector<8x128xf32>
    %3 = tpu.matmul %1, %2, %cst {dimension_numbers = #tpu.dot_dimension_numbers<[1], [0], [0], [1], [0, 0, 1, 1], [], []>} : vector<8x128xbf16>, vector<128x128xbf16>, vector<8x128xf32> -> vector<8x128xf32>
    %c0_3 = arith.constant 0 : index
    %c0_4 = arith.constant 0 : index
    %4 = vector.load %arg3[%c0_3, %c0_4] : memref<1x128xf32, #tpu.memory_space<vmem>>, vector<1x128xf32>
    %5 = vector.broadcast %4 : vector<1x128xf32> to vector<8x128xf32>
    %6 = arith.addf %3, %5 : vector<8x128xf32>
    %7 = math.tanh %6 : vector<8x128xf32>
    %8 = arith.truncf %7 : vector<8x128xf32> to vector<8x128xbf16>
    %c0_5 = arith.constant 0 : index
    %c0_6 = arith.constant 0 : index
    %9 = vector.load %arg4[%c0_5, %c0_6] : memref<128x128xbf16, #tpu.memory_space<vmem>>, vector<128x128xbf16>
    %cst_7 = arith.constant dense<0.000000e+00> : vector<8x128xf32>
    %10 = tpu.matmul %8, %9, %cst_7 {dimension_numbers = #tpu.dot_dimension_numbers<[1], [0], [0], [1], [0, 0, 1, 1], [], []>} : vector<8x128xbf16>, vector<128x128xbf16>, vector<8x128xf32> -> vector<8x128xf32>
    %c0_8 = arith.constant 0 : index
    %c0_9 = arith.constant 0 : index
    %11 = vector.load %arg5[%c0_8, %c0_9] : memref<1x128xf32, #tpu.memory_space<vmem>>, vector<1x128xf32>
    %12 = vector.broadcast %11 : vector<1x128xf32> to vector<8x128xf32>
    %13 = arith.addf %10, %12 : vector<8x128xf32>
    %c0_10 = arith.constant 0 : index
    %c0_11 = arith.constant 0 : index
    %14 = vector.load %arg10[%c0_10, %c0_11] : memref<8x128xf32, #tpu.memory_space<vmem>>, vector<8x128xf32>
    tpu.vector_store %arg10[%c0_10, %c0_11], %13 {strides = array<i32>} : memref<8x128xf32, #tpu.memory_space<vmem>>, vector<8x128xf32>,
    %15 = vector.shape_cast %7 : vector<8x128xf32> to vector<1x8x128xf32>
    %cst_12 = arith.constant dense<0.000000e+00> : vector<1x128xf32>
    %16 = vector.multi_reduction <add>, %15, %cst_12 [1] : vector<1x8x128xf32> to vector<1x128xf32>
    %cst_13 = arith.constant 1.250000e-01 : f32
    %17 = vector.broadcast %cst_13 : f32 to vector<1x128xf32>
    %18 = arith.mulf %16, %17 : vector<1x128xf32>
    %19 = arith.truncf %18 : vector<1x128xf32> to vector<1x128xbf16>
    %c0_14 = arith.constant 0 : index
    %c0_15 = arith.constant 0 : index
    %20 = vector.load %arg6[%c0_14, %c0_15] : memref<128x128xbf16, #tpu.memory_space<vmem>>, vector<128x128xbf16>
    %cst_16 = arith.constant dense<0.000000e+00> : vector<1x128xf32>
    %21 = tpu.matmul %19, %20, %cst_16 {dimension_numbers = #tpu.dot_dimension_numbers<[1], [0], [0], [1], [0, 0, 1, 1], [], []>} : vector<1x128xbf16>, vector<128x128xbf16>, vector<1x128xf32> -> vector<1x128xf32>
    %c0_17 = arith.constant 0 : index
    %c0_18 = arith.constant 0 : index
    %22 = vector.load %arg7[%c0_17, %c0_18] : memref<1x128xf32, #tpu.memory_space<vmem>>, vector<1x128xf32>
    %23 = arith.addf %21, %22 : vector<1x128xf32>
    %24 = arith.truncf %23 : vector<1x128xf32> to vector<1x128xbf16>
    %c0_19 = arith.constant 0 : index
    %c0_20 = arith.constant 0 : index
    %25 = vector.load %arg8[%c0_19, %c0_20] : memref<128x128xbf16, #tpu.memory_space<vmem>>, vector<128x128xbf16>
    %cst_21 = arith.constant dense<0.000000e+00> : vector<1x128xf32>
    %26 = tpu.matmul %24, %25, %cst_21 {dimension_numbers = #tpu.dot_dimension_numbers<[1], [0], [0], [1], [0, 0, 1, 1], [], []>} : vector<1x128xbf16>, vector<128x128xbf16>, vector<1x128xf32> -> vector<1x128xf32>
    %c0_22 = arith.constant 0 : index
    %c0_23 = arith.constant 0 : index
    %27 = vector.load %arg9[%c0_22, %c0_23] : memref<1x128xf32, #tpu.memory_space<vmem>>, vector<1x128xf32>
    %28 = arith.addf %26, %27 : vector<1x128xf32>
    %cst_24 = arith.constant 0.000000e+00 : f32
    %29 = vector.broadcast %cst_24 : f32 to vector<7x128xf32>
    %30 = tpu.concatenate %28, %29 in 0 : vector<1x128xf32>, vector<7x128xf32> -> vector<8x128xf32>
    %c0_25 = arith.constant 0 : index
    %c0_26 = arith.constant 0 : index
    %31 = vector.load %arg11[%c0_25, %c0_26] : memref<8x128xf32, #tpu.memory_space<vmem>>, vector<8x128xf32>
    tpu.vector_store %arg11[%c0_25, %c0_26], %30 {strides = array<i32>} : memref<8x128xf32, #tpu.memory_space<vmem>>, vector<8x128xf32>,
    return
  }
  func.func @transform_0(%arg0: i32) -> (i32, i32) {
    %c0_i32 = arith.constant 0 : i32
    %c0_i32_0 = arith.constant 0 : i32
    return %arg0, %c0_i32 : i32, i32
  }
  func.func @transform_1(%arg0: i32) -> (i32, i32) {
    %c0_i32 = arith.constant 0 : i32
    %c0_i32_0 = arith.constant 0 : i32
    %c0_i32_1 = arith.constant 0 : i32
    return %c0_i32, %c0_i32_0 : i32, i32
  }
  func.func @transform_2(%arg0: i32) -> (i32, i32) {
    %c0_i32 = arith.constant 0 : i32
    %c0_i32_0 = arith.constant 0 : i32
    %c0_i32_1 = arith.constant 0 : i32
    return %c0_i32, %c0_i32_0 : i32, i32
  }
  func.func @transform_3(%arg0: i32) -> (i32, i32) {
    %c0_i32 = arith.constant 0 : i32
    %c0_i32_0 = arith.constant 0 : i32
    %c0_i32_1 = arith.constant 0 : i32
    return %c0_i32, %c0_i32_0 : i32, i32
  }
  func.func @transform_4(%arg0: i32) -> (i32, i32) {
    %c0_i32 = arith.constant 0 : i32
    %c0_i32_0 = arith.constant 0 : i32
    %c0_i32_1 = arith.constant 0 : i32
    return %c0_i32, %c0_i32_0 : i32, i32
  }
  func.func @transform_5(%arg0: i32) -> (i32, i32) {
    %c0_i32 = arith.constant 0 : i32
    %c0_i32_0 = arith.constant 0 : i32
    %c0_i32_1 = arith.constant 0 : i32
    return %c0_i32, %c0_i32_0 : i32, i32
  }
  func.func @transform_6(%arg0: i32) -> (i32, i32) {
    %c0_i32 = arith.constant 0 : i32
    %c0_i32_0 = arith.constant 0 : i32
    %c0_i32_1 = arith.constant 0 : i32
    return %c0_i32, %c0_i32_0 : i32, i32
  }
  func.func @transform_7(%arg0: i32) -> (i32, i32) {
    %c0_i32 = arith.constant 0 : i32
    %c0_i32_0 = arith.constant 0 : i32
    %c0_i32_1 = arith.constant 0 : i32
    return %c0_i32, %c0_i32_0 : i32, i32
  }
  func.func @transform_8(%arg0: i32) -> (i32, i32) {
    %c0_i32 = arith.constant 0 : i32
    %c0_i32_0 = arith.constant 0 : i32
    %c0_i32_1 = arith.constant 0 : i32
    return %c0_i32, %c0_i32_0 : i32, i32
  }
  func.func @transform_9(%arg0: i32) -> (i32, i32) {
    %c0_i32 = arith.constant 0 : i32
    %c0_i32_0 = arith.constant 0 : i32
    return %arg0, %c0_i32 : i32, i32
  }
  func.func @transform_10(%arg0: i32) -> (i32, i32) {
    %c0_i32 = arith.constant 0 : i32
    %c0_i32_0 = arith.constant 0 : i32
    return %arg0, %c0_i32 : i32, i32
  }
}

module attributes {stable_mosaic.version = 11 : i64} {
  func.func @kernel(%arg0: i32, %arg1: memref<8x128xf32, #tpu.memory_space<vmem>>, %arg2: memref<128x128xbf16, #tpu.memory_space<vmem>>, %arg3: memref<1x128xf32, #tpu.memory_space<vmem>>, %arg4: memref<128x128xbf16, #tpu.memory_space<vmem>>, %arg5: memref<1x128xf32, #tpu.memory_space<vmem>>, %arg6: memref<128x128xbf16, #tpu.memory_space<vmem>>, %arg7: memref<1x128xf32, #tpu.memory_space<vmem>>, %arg8: memref<128x128xbf16, #tpu.memory_space<vmem>>, %arg9: memref<1x128xf32, #tpu.memory_space<vmem>>, %arg10: memref<8x128xf32, #tpu.memory_space<vmem>>, %arg11: memref<8x128xf32, #tpu.memory_space<vmem>>) attributes {dimension_semantics = [#tpu.dimension_semantics<parallel>], iteration_bounds = array<i64: 2>, scalar_prefetch = 0 : i64, scratch_operands = 0 : i64, tpu.core_type = #tpu.core_type<tc>, window_params = [{transform_indices = @transform_0, window_bounds = array<i64: 8, 128>}, {pipeline_mode = #tpu.pipeline_mode<synchronous>, transform_indices = @transform_1, window_bounds = array<i64: 128, 128>}, {pipeline_mode = #tpu.pipeline_mode<synchronous>, transform_indices = @transform_2, window_bounds = array<i64: 1, 128>}, {pipeline_mode = #tpu.pipeline_mode<synchronous>, transform_indices = @transform_3, window_bounds = array<i64: 128, 128>}, {pipeline_mode = #tpu.pipeline_mode<synchronous>, transform_indices = @transform_4, window_bounds = array<i64: 1, 128>}, {pipeline_mode = #tpu.pipeline_mode<synchronous>, transform_indices = @transform_5, window_bounds = array<i64: 128, 128>}, {pipeline_mode = #tpu.pipeline_mode<synchronous>, transform_indices = @transform_6, window_bounds = array<i64: 1, 128>}, {pipeline_mode = #tpu.pipeline_mode<synchronous>, transform_indices = @transform_7, window_bounds = array<i64: 128, 128>}, {pipeline_mode = #tpu.pipeline_mode<synchronous>, transform_indices = @transform_8, window_bounds = array<i64: 1, 128>}, {transform_indices = @transform_9, window_bounds = array<i64: 8, 128>}, {transform_indices = @transform_10, window_bounds = array<i64: 8, 128>}]} {
    %c0 = arith.constant 0 : index
    %c0_0 = arith.constant 0 : index
    %0 = vector.load %arg1[%c0, %c0_0] : memref<8x128xf32, #tpu.memory_space<vmem>>, vector<8x128xf32>
    %1 = arith.truncf %0 : vector<8x128xf32> to vector<8x128xbf16>
    %c0_1 = arith.constant 0 : index
    %c0_2 = arith.constant 0 : index
    %2 = vector.load %arg2[%c0_1, %c0_2] : memref<128x128xbf16, #tpu.memory_space<vmem>>, vector<128x128xbf16>
    %cst = arith.constant dense<0.000000e+00> : vector<8x128xf32>
    %3 = tpu.matmul %1, %2, %cst {dimension_numbers = #tpu.dot_dimension_numbers<[1], [0], [0], [1], [0, 0, 1, 1], [], []>} : vector<8x128xbf16>, vector<128x128xbf16>, vector<8x128xf32> -> vector<8x128xf32>
    %c0_3 = arith.constant 0 : index
    %c0_4 = arith.constant 0 : index
    %4 = vector.load %arg3[%c0_3, %c0_4] : memref<1x128xf32, #tpu.memory_space<vmem>>, vector<1x128xf32>
    %5 = vector.broadcast %4 : vector<1x128xf32> to vector<8x128xf32>
    %6 = arith.addf %3, %5 : vector<8x128xf32>
    %7 = math.tanh %6 : vector<8x128xf32>
    %8 = arith.truncf %7 : vector<8x128xf32> to vector<8x128xbf16>
    %c0_5 = arith.constant 0 : index
    %c0_6 = arith.constant 0 : index
    %9 = vector.load %arg4[%c0_5, %c0_6] : memref<128x128xbf16, #tpu.memory_space<vmem>>, vector<128x128xbf16>
    %cst_7 = arith.constant dense<0.000000e+00> : vector<8x128xf32>
    %10 = tpu.matmul %8, %9, %cst_7 {dimension_numbers = #tpu.dot_dimension_numbers<[1], [0], [0], [1], [0, 0, 1, 1], [], []>} : vector<8x128xbf16>, vector<128x128xbf16>, vector<8x128xf32> -> vector<8x128xf32>
    %c0_8 = arith.constant 0 : index
    %c0_9 = arith.constant 0 : index
    %11 = vector.load %arg5[%c0_8, %c0_9] : memref<1x128xf32, #tpu.memory_space<vmem>>, vector<1x128xf32>
    %12 = vector.broadcast %11 : vector<1x128xf32> to vector<8x128xf32>
    %13 = arith.addf %10, %12 : vector<8x128xf32>
    %c0_10 = arith.constant 0 : index
    %c0_11 = arith.constant 0 : index
    %14 = vector.load %arg10[%c0_10, %c0_11] : memref<8x128xf32, #tpu.memory_space<vmem>>, vector<8x128xf32>
    tpu.vector_store %arg10[%c0_10, %c0_11], %13 {strides = array<i32>} : memref<8x128xf32, #tpu.memory_space<vmem>>, vector<8x128xf32>,
    %15 = vector.shape_cast %7 : vector<8x128xf32> to vector<1x8x128xf32>
    %cst_12 = arith.constant dense<0.000000e+00> : vector<1x128xf32>
    %16 = vector.multi_reduction <add>, %15, %cst_12 [1] : vector<1x8x128xf32> to vector<1x128xf32>
    %cst_13 = arith.constant 1.250000e-01 : f32
    %17 = vector.broadcast %cst_13 : f32 to vector<1x128xf32>
    %18 = arith.mulf %16, %17 : vector<1x128xf32>
    %19 = arith.truncf %18 : vector<1x128xf32> to vector<1x128xbf16>
    %c0_14 = arith.constant 0 : index
    %c0_15 = arith.constant 0 : index
    %20 = vector.load %arg6[%c0_14, %c0_15] : memref<128x128xbf16, #tpu.memory_space<vmem>>, vector<128x128xbf16>
    %cst_16 = arith.constant dense<0.000000e+00> : vector<1x128xf32>
    %21 = tpu.matmul %19, %20, %cst_16 {dimension_numbers = #tpu.dot_dimension_numbers<[1], [0], [0], [1], [0, 0, 1, 1], [], []>} : vector<1x128xbf16>, vector<128x128xbf16>, vector<1x128xf32> -> vector<1x128xf32>
    %c0_17 = arith.constant 0 : index
    %c0_18 = arith.constant 0 : index
    %22 = vector.load %arg7[%c0_17, %c0_18] : memref<1x128xf32, #tpu.memory_space<vmem>>, vector<1x128xf32>
    %23 = arith.addf %21, %22 : vector<1x128xf32>
    %24 = arith.truncf %23 : vector<1x128xf32> to vector<1x128xbf16>
    %c0_19 = arith.constant 0 : index
    %c0_20 = arith.constant 0 : index
    %25 = vector.load %arg8[%c0_19, %c0_20] : memref<128x128xbf16, #tpu.memory_space<vmem>>, vector<128x128xbf16>
    %cst_21 = arith.constant dense<0.000000e+00> : vector<1x128xf32>
    %26 = tpu.matmul %24, %25, %cst_21 {dimension_numbers = #tpu.dot_dimension_numbers<[1], [0], [0], [1], [0, 0, 1, 1], [], []>} : vector<1x128xbf16>, vector<128x128xbf16>, vector<1x128xf32> -> vector<1x128xf32>
    %c0_22 = arith.constant 0 : index
    %c0_23 = arith.constant 0 : index
    %27 = vector.load %arg9[%c0_22, %c0_23] : memref<1x128xf32, #tpu.memory_space<vmem>>, vector<1x128xf32>
    %28 = arith.addf %26, %27 : vector<1x128xf32>
    %cst_24 = arith.constant 0.000000e+00 : f32
    %29 = vector.broadcast %cst_24 : f32 to vector<7x128xf32>
    %30 = tpu.concatenate %28, %29 in 0 : vector<1x128xf32>, vector<7x128xf32> -> vector<8x128xf32>
    %c0_25 = arith.constant 0 : index
    %c0_26 = arith.constant 0 : index
    %31 = vector.load %arg11[%c0_25, %c0_26] : memref<8x128xf32, #tpu.memory_space<vmem>>, vector<8x128xf32>
    tpu.vector_store %arg11[%c0_25, %c0_26], %30 {strides = array<i32>} : memref<8x128xf32, #tpu.memory_space<vmem>>, vector<8x128xf32>,
    return
  }
  func.func @transform_0(%arg0: i32) -> (i32, i32) {
    %c0_i32 = arith.constant 0 : i32
    %c0_i32_0 = arith.constant 0 : i32
    return %arg0, %c0_i32 : i32, i32
  }
  func.func @transform_1(%arg0: i32) -> (i32, i32) {
    %c0_i32 = arith.constant 0 : i32
    %c0_i32_0 = arith.constant 0 : i32
    %c0_i32_1 = arith.constant 0 : i32
    return %c0_i32, %c0_i32_0 : i32, i32
  }
  func.func @transform_2(%arg0: i32) -> (i32, i32) {
    %c0_i32 = arith.constant 0 : i32
    %c0_i32_0 = arith.constant 0 : i32
    %c0_i32_1 = arith.constant 0 : i32
    return %c0_i32, %c0_i32_0 : i32, i32
  }
  func.func @transform_3(%arg0: i32) -> (i32, i32) {
    %c0_i32 = arith.constant 0 : i32
    %c0_i32_0 = arith.constant 0 : i32
    %c0_i32_1 = arith.constant 0 : i32
    return %c0_i32, %c0_i32_0 : i32, i32
  }
  func.func @transform_4(%arg0: i32) -> (i32, i32) {
    %c0_i32 = arith.constant 0 : i32
    %c0_i32_0 = arith.constant 0 : i32
    %c0_i32_1 = arith.constant 0 : i32
    return %c0_i32, %c0_i32_0 : i32, i32
  }
  func.func @transform_5(%arg0: i32) -> (i32, i32) {
    %c0_i32 = arith.constant 0 : i32
    %c0_i32_0 = arith.constant 0 : i32
    %c0_i32_1 = arith.constant 0 : i32
    return %c0_i32, %c0_i32_0 : i32, i32
  }
  func.func @transform_6(%arg0: i32) -> (i32, i32) {
    %c0_i32 = arith.constant 0 : i32
    %c0_i32_0 = arith.constant 0 : i32
    %c0_i32_1 = arith.constant 0 : i32
    return %c0_i32, %c0_i32_0 : i32, i32
  }
  func.func @transform_7(%arg0: i32) -> (i32, i32) {
    %c0_i32 = arith.constant 0 : i32
    %c0_i32_0 = arith.constant 0 : i32
    %c0_i32_1 = arith.constant 0 : i32
    return %c0_i32, %c0_i32_0 : i32, i32
  }
  func.func @transform_8(%arg0: i32) -> (i32, i32) {
    %c0_i32 = arith.constant 0 : i32
    %c0_i32_0 = arith.constant 0 : i32
    %c0_i32_1 = arith.constant 0 : i32
    return %c0_i32, %c0_i32_0 : i32, i32
  }
  func.func @transform_9(%arg0: i32) -> (i32, i32) {
    %c0_i32 = arith.constant 0 : i32
    %c0_i32_0 = arith.constant 0 : i32
    return %arg0, %c0_i32 : i32, i32
  }
  func.func @transform_10(%arg0: i32) -> (i32, i32) {
    %c0_i32 = arith.constant 0 : i32
    %c0_i32_0 = arith.constant 0 : i32
    return %arg0, %c0_i32 : i32, i32
  }
}

</mosaic_0001>

<bundles_post_ra>
// kernel: tpu_custom_call.1
= control target key start
LH: loop header
LB: loop body
LE: loop exit
PB: predicated region body
PF: predicated region fallthrough
CT: control target
= control target key end

     0   :  { %s2391_s0 = inlined_call_operand.hbm [shape: f32[16,128], index: 0, kind: input, shape index: {}]   ;;  %s2392_s1 = inlined_call_operand.hbm [shape: bf16[128,128], index: 1, kind: input, shape index: {}]   ;;  %s2393_s2 = inlined_call_operand.hbm [shape: f32[1,128], index: 2, kind: input, shape index: {}]   ;;  %s2394_s3 = inlined_call_operand.hbm [shape: bf16[128,128], index: 3, kind: input, shape index: {}]   ;;  %s2395_s4 = inlined_call_operand.hbm [shape: f32[1,128], index: 4, kind: input, shape index: {}]   ;;  %s2396_s5 = inlined_call_operand.hbm [shape: bf16[128,128], index: 5, kind: input, shape index: {}]   ;;  %s2397_s6 = inlined_call_operand.hbm [shape: f32[1,128], index: 6, kind: input, shape index: {}]   ;;  %s2398_s7 = inlined_call_operand.hbm [shape: bf16[128,128], index: 7, kind: input, shape index: {}]   ;;  %s2399_s8 = inlined_call_operand.hbm [shape: f32[1,128], index: 8, kind: input, shape index: {}]   ;;  %s2400_s9 = inlined_call_operand.hbm [shape: f32[16,128], index: 9, kind: output, shape index: {0}]   ;;  %s2401_s10 = inlined_call_operand.hbm [shape: f32[16,128], index: 10, kind: output, shape index: {1}]  }
   0x1   :  { %2408 = sst [smem:[#allocation27_spill]] %s2392_s1 }
   0x2   :  { %2409 = sst [smem:[#allocation28_spill]] %s2400_s9 }
   0x3   :  { %2410 = sst [smem:[#allocation29_spill]] %s2401_s10 }
   0x4   :  { %16 = vsyncpa [#allocation3], 0 }
   0x5   :  { %18 = vsyncpa [#allocation3 + $0x1], 0 }
   0x6   :  { %19 = vsyncpa [#allocation6], 0 }
   0x7   :  { %20 = vsyncpa [#allocation9], 0 }
   0x8   :  { %21 = vsyncpa [#allocation12], 0 }
   0x9   :  { %22 = vsyncpa [#allocation15], 0 }
   0xa   :  { %23 = vsyncpa [#allocation4], 0 }
   0xb   :  { %25 = vsyncpa [#allocation4 + $0x1], 0 }
   0xc   :  { %26 = vsyncpa [#allocation19], 0 }
   0xd   :  { %28 = vsyncpa [#allocation19 + $0x1], 0  ;;  %s1945_s13 = smov 0   ;;  %s1947_s14 = smov 0  }
   0xe   :  { %s1949_s15 = smov 0   ;;  %s1951_s16 = smov 0  }
   0xf LB: > { %s1875_s17 = smov [#allocation5]   ;;  %s1966_s19 = sadd.s32 4294967295, %s1873_s16   ;;  %s1873_s16 = sphi %s1951_s16, %s2439_s16   ;;  %s1869_s15 = sphi %s1949_s15, %s2438_s15   ;;  %s1865_s14 = sphi %s1947_s14, %s2437_s14   ;;  %s1861_s13 = sphi %s1945_s13, %s2436_s13  }
  0x10   : > { %s297_s18 = sshll.u32 %s1875_s17, 4  ;;  %p1155_p0 = scmp.ge.s32.totalorder %s1873_s16, 1  ;;  %s1971_s18 = int_to_ptr.vmem [resolvable:$true] %s297_s18 }
  0x11   : > { %p2404_p1 = scmp.eq.s32.totalorder %s1966_s19, 0  ;;  %p285_p2 = scmp.lt.s32.totalorder %s1873_s16, 3 }
  0x12   : > { %s1876_s21 = smov [#allocation8]   ;;  %s1877_s24 = smov [#allocation11]  }
  0x13   : > { %p1973_p3 = pnand %p1155_p0, %p285_p2  ;;  %s321_s22 = sshll.u32 %s1876_s21, 4  ;;  %s1986_s22 = int_to_ptr.vmem [resolvable:$true] %s321_s22 }
  0x14   : > { %s345_s25 = sshll.u32 %s1877_s24, 4  ;;  %s2413_s1 = sld [smem:[#allocation27_spill]]  ;;  %s1988_s25 = int_to_ptr.vmem [resolvable:$true] %s345_s25 }
  0x15   : > { %s2411_s20 = scalar_select %p1973_p3, 1, 0 }
  0x16   : > { %p1373_p5 = pneg %p1973_p3 }
  0x18   : > { %p1982_p6 = pnand %p1373_p5, %p2404_p1 }
  0x1a   : > { %s1505_s28 = scalar_lea.hbm %s2413_s1, 1024  ;;  %p1998_p8 = pneg %p1982_p6 }
  0x1b   : > { %p1506_p7 = scmp.ne.s32.totalorder %s2413_s1, %s1505_s28  ;;  %p1512_p11 = scmp.lt.u32.totalorder %s1505_s28, %s2413_s1 }
  0x1d   : > { %p1508_p9 = pnand %p1998_p8, %p1506_p7 }
  0x1f   : > { %p1509_p10 = pneg %p1508_p9 }
  0x21   : > { %p1514_p12 = pnand %p1512_p11, %p1509_p10 }
  0x23   : > { %1517 = shalt.err (!%p1514_p12)
}
  0x24   : > { %s1518_s21 = scalar_lea.vmem %s1971_s18, 1024  ;;  %p1526_p5 = scmp.lt.s32.totalorder %s1971_s18, %s1971_s18 }
  0x25   : > { %p1519_p13 = scmp.ne.s32.totalorder %s1971_s18, %s1518_s21  ;;  %p1527_p4 = scmp.lt.s32.totalorder %s1518_s21, %s1518_s21 }
  0x27   : > { %p1521_p0 = pnand %p1519_p13, %p1998_p8  ;;  %p1528_p7 = por %p1527_p4, %p1526_p5 }
  0x29   : > { %p1522_p2 = pneg %p1521_p0 }
  0x2b   : > { %p1529_p9 = pnand %p1528_p7, %p1522_p2 }
  0x2d   : > { %1532 = shalt.err (!%p1529_p9)
}
  0x2e   : > { %s1878_s24 = smov 64   ;;  %s1879_s26 = smov 4  }
  0x2f   : > { %1376 = dma.hbm_to_vmem [thread:$0]  (!%p1982_p6), %s2413_s1, 1024, %s1971_s18, [#allocation6], %s1878_s24, %s1878_s24, %s1879_s26  }
  0x30   : > { %s1533_s12 = scalar_lea.hbm %s2394_s3, 1024 }
  0x31   : > { %p1534_p4 = scmp.ne.s32.totalorder %s2394_s3, %s1533_s12  ;;  %p1540_p12 = scmp.lt.u32.totalorder %s1533_s12, %s2394_s3 }
  0x33   : > { %p1536_p10 = pnand %p1534_p4, %p1998_p8 }
  0x35   : > { %p1537_p11 = pneg %p1536_p10 }
  0x37   : > { %p1542_p13 = pnand %p1540_p12, %p1537_p11 }
  0x39   : > { %1545 = shalt.err (!%p1542_p13)
}
  0x3a   : > { %s1546_s18 = scalar_lea.vmem %s1986_s22, 1024  ;;  %p1554_p7 = scmp.lt.s32.totalorder %s1986_s22, %s1986_s22 }
  0x3b   : > { %p1547_p0 = scmp.ne.s32.totalorder %s1986_s22, %s1546_s18  ;;  %p1555_p9 = scmp.lt.s32.totalorder %s1546_s18, %s1546_s18 }
  0x3d   : > { %p1549_p2 = pnand %p1547_p0, %p1998_p8  ;;  %p1556_p4 = por %p1555_p9, %p1554_p7 }
  0x3f   : > { %p1550_p5 = pneg %p1549_p2 }
  0x41   : > { %p1557_p10 = pnand %p1556_p4, %p1550_p5 }
  0x43   : > { %1560 = shalt.err (!%p1557_p10)
}
  0x44   : > { %1382 = dma.hbm_to_vmem [thread:$0]  (!%p1982_p6), %s2394_s3, 1024, %s1986_s22, [#allocation9], %s1878_s24, %s1878_s24, %s1879_s26  }
  0x45   : > { %s1561_s29 = scalar_lea.hbm %s2396_s5, 1024 }
  0x46   : > { %p1562_p11 = scmp.ne.s32.totalorder %s2396_s5, %s1561_s29  ;;  %p1568_p0 = scmp.lt.u32.totalorder %s1561_s29, %s2396_s5 }
  0x48   : > { %p1564_p12 = pnand %p1562_p11, %p1998_p8 }
  0x4a   : > { %p1565_p13 = pneg %p1564_p12 }
  0x4c   : > { %p1570_p2 = pnand %p1568_p0, %p1565_p13 }
  0x4e   : > { %1573 = shalt.err (!%p1570_p2)
}
  0x4f   : > { %s1574_s22 = scalar_lea.vmem %s1988_s25, 1024  ;;  %p1582_p4 = scmp.lt.s32.totalorder %s1988_s25, %s1988_s25 }
  0x50   : > { %p1575_p5 = scmp.ne.s32.totalorder %s1988_s25, %s1574_s22  ;;  %p1583_p10 = scmp.lt.s32.totalorder %s1574_s22, %s1574_s22 }
  0x52   : > { %p1577_p7 = pnand %p1575_p5, %p1998_p8  ;;  %p1584_p11 = por %p1583_p10, %p1582_p4 }
  0x54   : > { %p1578_p9 = pneg %p1577_p7 }
  0x56   : > { %p1585_p12 = pnand %p1584_p11, %p1578_p9 }
  0x58   : > { %1588 = shalt.err (!%p1585_p12)
}
  0x59   : > { %1388 = dma.hbm_to_vmem [thread:$0]  (!%p1982_p6), %s2396_s5, 1024, %s1988_s25, [#allocation12], %s1878_s24, %s1878_s24, %s1879_s26  }
  0x5a   : > { %s1880_s10 = smov [#allocation14]   ;;  %s1881_s28 = smov [#allocation7]  }
  0x5b   : > { %s369_s27 = sshll.u32 %s1880_s10, 4  ;;  %s311_s29 = sshll.u32 %s1881_s28, 4  ;;  %s370_s27 = int_to_ptr.vmem [resolvable:$true] %s369_s27  ;;  %s312_s29 = int_to_ptr.vmem [resolvable:$true] %s311_s29 }
  0x5c   : > { %s1589_s17 = scalar_lea.hbm %s2398_s7, 1024 }
  0x5d   : > { %p1590_p13 = scmp.ne.s32.totalorder %s2398_s7, %s1589_s17  ;;  %p1596_p5 = scmp.lt.u32.totalorder %s1589_s17, %s2398_s7 }
  0x5f   : > { %p1592_p0 = pnand %p1590_p13, %p1998_p8 }
  0x61   : > { %p1593_p2 = pneg %p1592_p0 }
  0x63   : > { %p1598_p7 = pnand %p1596_p5, %p1593_p2 }
  0x65   : > { %1601 = shalt.err (!%p1598_p7)
}
  0x66   : > { %s1602_s25 = scalar_lea.vmem %s370_s27, 1024  ;;  %p1610_p11 = scmp.lt.s32.totalorder %s370_s27, %s370_s27 }
  0x67   : > { %p1603_p9 = scmp.ne.s32.totalorder %s370_s27, %s1602_s25  ;;  %p1611_p12 = scmp.lt.s32.totalorder %s1602_s25, %s1602_s25 }
  0x69   : > { %p1605_p4 = pnand %p1603_p9, %p1998_p8  ;;  %p1612_p1 = por %p1611_p12, %p1610_p11 }
  0x6b   : > { %p1606_p10 = pneg %p1605_p4 }
  0x6d   : > { %p1613_p3 = pnand %p1612_p1, %p1606_p10 }
  0x6f   : > { %1616 = shalt.err (!%p1613_p3)
}
  0x70   : > { %1394 = dma.hbm_to_vmem [thread:$0]  (!%p1982_p6), %s2398_s7, 1024, %s370_s27, [#allocation15], %s1878_s24, %s1878_s24, %s1879_s26  }
  0x71   : > { %s1617_s30 = scalar_lea.hbm %s2393_s2, 16 }
  0x72   : > { %p1618_p1 = scmp.ne.s32.totalorder %s2393_s2, %s1617_s30  ;;  %p1624_p0 = scmp.lt.u32.totalorder %s1617_s30, %s2393_s2 }
  0x74   : > { %p1620_p3 = pnand %p1618_p1, %p1998_p8 }
  0x76   : > { %p1621_p13 = pneg %p1620_p3 }
  0x78   : > { %p1626_p2 = pnand %p1624_p0, %p1621_p13 }
  0x7a   : > { %1629 = shalt.err (!%p1626_p2)
}
  0x7b   : > { %s1630_s18 = scalar_lea.vmem %s312_s29, 16  ;;  %s1637_s24 = scalar_lea.vmem %s312_s29, 32 }
  0x7c   : > { %p1631_p5 = scmp.ne.s32.totalorder %s312_s29, %s1630_s18  ;;  %p1638_p4 = scmp.lt.s32.totalorder %s312_s29, %s312_s29 }
  0x7d   : > { %p1639_p10 = scmp.lt.s32.totalorder %s1637_s24, %s1630_s18 }
  0x7e   : > { %p1633_p7 = pnand %p1631_p5, %p1998_p8 }
  0x7f   : > { %p1640_p11 = por %p1639_p10, %p1638_p4 }
  0x80   : > { %p1634_p9 = pneg %p1633_p7 }
  0x82   : > { %p1641_p12 = pnand %p1640_p11, %p1634_p9 }
  0x84   : > { %1644 = shalt.err (!%p1641_p12)
}
  0x85   : > { %1379 = dma.hbm_to_vmem [thread:$0]  (!%p1982_p6), %s2393_s2, 16, %s312_s29, [#allocation6]  }
  0x86   : > { %s1882_s25 = smov [#allocation10]   ;;  %s1883_s9 = smov [#allocation13]  }
  0x87   : > { %s335_s1 = sshll.u32 %s1882_s25, 4  ;;  %s359_s10 = sshll.u32 %s1883_s9, 4  ;;  %s336_s1 = int_to_ptr.vmem [resolvable:$true] %s335_s1  ;;  %s360_s10 = int_to_ptr.vmem [resolvable:$true] %s359_s10 }
  0x88   : > { %s1645_s12 = scalar_lea.hbm %s2395_s4, 16 }
  0x89   : > { %p1646_p1 = scmp.ne.s32.totalorder %s2395_s4, %s1645_s12  ;;  %p1652_p0 = scmp.lt.u32.totalorder %s1645_s12, %s2395_s4 }
  0x8b   : > { %p1648_p3 = pnand %p1646_p1, %p1998_p8 }
  0x8d   : > { %p1649_p13 = pneg %p1648_p3 }
  0x8f   : > { %p1654_p2 = pnand %p1652_p0, %p1649_p13 }
  0x91   : > { %1657 = shalt.err (!%p1654_p2)
}
  0x92   : > { %s1658_s29 = scalar_lea.vmem %s336_s1, 16  ;;  %s1665_s24 = scalar_lea.vmem %s336_s1, 32 }
  0x93   : > { %p1659_p5 = scmp.ne.s32.totalorder %s336_s1, %s1658_s29  ;;  %p1666_p4 = scmp.lt.s32.totalorder %s336_s1, %s336_s1 }
  0x94   : > { %p1667_p10 = scmp.lt.s32.totalorder %s1665_s24, %s1658_s29 }
  0x95   : > { %p1661_p7 = pnand %p1659_p5, %p1998_p8 }
  0x96   : > { %p1668_p11 = por %p1667_p10, %p1666_p4 }
  0x97   : > { %p1662_p9 = pneg %p1661_p7 }
  0x99   : > { %p1669_p12 = pnand %p1668_p11, %p1662_p9 }
  0x9b   : > { %1672 = shalt.err (!%p1669_p12)
}
  0x9c   : > { %1385 = dma.hbm_to_vmem [thread:$0]  (!%p1982_p6), %s2395_s4, 16, %s336_s1, [#allocation9]  }
  0x9d   : > { %s1673_s28 = scalar_lea.hbm %s2397_s6, 16 }
  0x9e   : > { %p1674_p1 = scmp.ne.s32.totalorder %s2397_s6, %s1673_s28  ;;  %p1680_p0 = scmp.lt.u32.totalorder %s1673_s28, %s2397_s6 }
  0xa0   : > { %p1676_p3 = pnand %p1674_p1, %p1998_p8 }
  0xa2   : > { %p1677_p13 = pneg %p1676_p3 }
  0xa4   : > { %p1682_p2 = pnand %p1680_p0, %p1677_p13 }
  0xa6   : > { %1685 = shalt.err (!%p1682_p2)
}
  0xa7   : > { %s1686_s22 = scalar_lea.vmem %s360_s10, 16  ;;  %s1693_s1 = scalar_lea.vmem %s360_s10, 32 }
  0xa8   : > { %p1687_p5 = scmp.ne.s32.totalorder %s360_s10, %s1686_s22  ;;  %p1694_p4 = scmp.lt.s32.totalorder %s360_s10, %s360_s10 }
  0xa9   : > { %p1695_p10 = scmp.lt.s32.totalorder %s1693_s1, %s1686_s22 }
  0xaa   : > { %p1689_p7 = pnand %p1687_p5, %p1998_p8 }
  0xab   : > { %p1696_p11 = por %p1695_p10, %p1694_p4 }
  0xac   : > { %p1690_p9 = pneg %p1689_p7 }
  0xae   : > { %p1697_p12 = pnand %p1696_p11, %p1690_p9 }
  0xb0   : > { %1700 = shalt.err (!%p1697_p12)
}
  0xb1   : > { %1391 = dma.hbm_to_vmem [thread:$0]  (!%p1982_p6), %s2397_s6, 16, %s360_s10, [#allocation12]  }
  0xb2   : > { %s1884_s24 = smov [#allocation16]   ;;  %s1701_s9 = scalar_lea.hbm %s2399_s8, 16 }
  0xb3   : > { %s383_s26 = sshll.u32 %s1884_s24, 4  ;;  %p1702_p1 = scmp.ne.s32.totalorder %s2399_s8, %s1701_s9  ;;  %s384_s26 = int_to_ptr.vmem [resolvable:$true] %s383_s26 }
  0xb4   : > { %p1708_p0 = scmp.lt.u32.totalorder %s1701_s9, %s2399_s8 }
  0xb5   : > { %p1704_p3 = pnand %p1702_p1, %p1998_p8 }
  0xb7   : > { %p1705_p13 = pneg %p1704_p3 }
  0xb9   : > { %p1710_p2 = pnand %p1708_p0, %p1705_p13 }
  0xbb   : > { %1713 = shalt.err (!%p1710_p2)
}
  0xbc   : > { %s1714_s10 = scalar_lea.vmem %s384_s26, 16  ;;  %s1721_s21 = scalar_lea.vmem %s384_s26, 32 }
  0xbd   : > { %p1715_p5 = scmp.ne.s32.totalorder %s384_s26, %s1714_s10  ;;  %p1722_p4 = scmp.lt.s32.totalorder %s384_s26, %s384_s26 }
  0xbe   : > { %p1723_p10 = scmp.lt.s32.totalorder %s1721_s21, %s1714_s10 }
  0xbf   : > { %p1717_p7 = pnand %p1715_p5, %p1998_p8 }
  0xc0   : > { %p1724_p11 = por %p1723_p10, %p1722_p4 }
  0xc1   : > { %p1718_p9 = pneg %p1717_p7 }
  0xc3   : > { %p1725_p12 = pnand %p1724_p11, %p1718_p9 }
  0xc5   : > { %1728 = shalt.err (!%p1725_p12)
}
  0xc6   : > { %1397 = dma.hbm_to_vmem [thread:$0]  (!%p1982_p6), %s2399_s8, 16, %s384_s26, [#allocation15]  }
  0xc7   : > { %s1154_s11 = sadd.s32 4294967294, %s1873_s16   ;;  %s2169_s23 = sadd.s32 1, %s1873_s16  }
  0xc8   : > { %s38_s18 = ssub.s32 %s1873_s16, %s2169_s23  ;;  %s41_s29 = sadd.s32 1, %s1869_s15 }
  0xc9   : > { %p39_p8 = scmp.eq.s32.totalorder %s38_s18, 0  ;;  %p48_p1 = scmp.ne.s32.totalorder %s1869_s15, %s1865_s14 }
  0xca   : > { %p49_p3 = scmp.eq.s32.totalorder %s1873_s16, 0  ;;  %p54_p13 = scmp.ne.s32.totalorder %s1865_s14, %s1861_s13 }
  0xcb   : > { %s2180_s24 = scalar_select %p39_p8, %s1869_s15, %s41_s29  }
  0xcc   : > { %p2182_p0 = por %p49_p3, %p48_p1  ;;  %p2416_p2 = scmp.eq.s32.totalorder %s1966_s19, 0 }
  0xcd   : > { %p246_p5 = scmp.eq.s32.totalorder %s1966_s19, 1  ;;  %p252_p7 = scmp.eq.s32.totalorder %s1154_s11, 1 }
  0xce   : > { %p2188_p6 = por %p2416_p2, %p54_p13  ;;  %p1417_p9 = scmp.lt.s32.totalorder %s1873_s16, 2 }
  0xcf   : > { %s394_s25 = sand.u32 1, %s1869_s15   ;;  %p2195_p4 = por %p246_p5, %p48_p1 }
  0xd0   : > { %p2199_p10 = por %p252_p7, %p54_p13  ;;  %s1165_s30 = sshll.u32 %s394_s25, 3 }
  0xd1   : > { %s2418_s9 = scalar_select %p2195_p4, 1, 0 }
  0xd2   : > { %s2419_s28 = scalar_select %p2199_p10, 1, 0 }
  0xd3   : > { %s1166_s12 = sshll.u32 %s1873_s16, 7  ;;  %s398_s22 = scalar_lea.vmem [#allocation2], %s1165_s30 }
  0xd4   : > { %s2207_s21 = scalar_lea.hbm %s2391_s0, %s1166_s12  ;;  %s405_s1 = sshll.u32 %s398_s22, 4  ;;  %s2209_s1 = int_to_ptr.vmem [resolvable:$true] %s405_s1 }
  0xd5   : > { %p2213_p11 = pnand %p1417_p9, %p2182_p0  ;;  %s395_s18 = scalar_lea.sflag [#allocation3], %s394_s25 }
  0xd6   : > { %s1729_s29 = scalar_lea.hbm %s2207_s21, 128  ;;  %s1734_s17 = scalar_lea.hbm %s2391_s0, 256 }
  0xd7   : > { %p1730_p12 = scmp.ne.s32.totalorder %s2207_s21, %s1729_s29  ;;  %p1731_p8 = pneg %p2213_p11 }
  0xd8   : > { %p1735_p13 = scmp.lt.u32.totalorder %s2207_s21, %s2391_s0  ;;  %p1736_p0 = scmp.lt.u32.totalorder %s1734_s17, %s1729_s29 }
  0xd9   : > { %p1732_p1 = pnand %p1731_p8, %p1730_p12  ;;  %p1738_p5 = scmp.lt.u32.totalorder %s1729_s29, %s2207_s21 }
  0xda   : > { %p1737_p2 = por %p1736_p0, %p1735_p13 }
  0xdb   : > { %p1733_p3 = pneg %p1732_p1 }
  0xdc   : > { %p1739_p7 = por %p1738_p5, %p1737_p2 }
  0xde   : > { %p1740_p9 = pnand %p1739_p7, %p1733_p3 }
  0xe0   : > { %1743 = shalt.err (!%p1740_p9)
}
  0xe1   : > { %s1744_s25 = scalar_lea.vmem %s2209_s1, 128  ;;  %s1885_s22 = smov [#allocation2]  }
  0xe2   : > { %p1745_p12 = scmp.ne.s32.totalorder %s2209_s1, %s1744_s25  ;;  %s1749_s30 = sshll.u32 %s1885_s22, 4  ;;  %s1750_s30 = int_to_ptr.vmem [resolvable:$false] %s1749_s30 }
  0xe3   : > { %s1751_s12 = scalar_lea.vmem %s1750_s30, 256  ;;  %p1752_p4 = scmp.lt.s32.totalorder %s2209_s1, %s1750_s30 }
  0xe4   : > { %p1747_p1 = pnand %p1745_p12, %p1731_p8  ;;  %p1753_p13 = scmp.lt.s32.totalorder %s1751_s12, %s1744_s25 }
  0xe6   : > { %p1748_p10 = pneg %p1747_p1  ;;  %p1754_p0 = por %p1753_p13, %p1752_p4 }
  0xe8   : > { %p1755_p2 = pnand %p1754_p0, %p1748_p10 }
  0xea   : > { %1758 = shalt.err (!%p1755_p2)
}
  0xeb   : > { %1401 = dma.hbm_to_vmem [thread:$0]  (!%p2213_p11), %s2207_s21, 128, %s2209_s1, %s395_s18  }
  0xec   : > { %p2421_p3 = scmp.ne.s32.totalorder %s2411_s20, 0 }
  0xed   : > { %s2245_s29 = sand.u32 (!%p2421_p3), 1, %s1865_s14  }
  0xee   : > { %414 = sbr.rel (%p2421_p3) target bundleno = 978 (0x3d2), region = 56  ;;  %s2248_s17 = sshll.u32 (!%p2421_p3), %s2245_s29, 3 }
  0xef   : > { %s417_s27 = scalar_lea.sflag (!%p2421_p3), [#allocation3], %s2245_s29  ;;  %s420_s10 = scalar_lea.vmem (!%p2421_p3), [#allocation2], %s2248_s17 }
  0xf5   : > { %1832 = dma.done.wait (%p2188_p6), %s417_s27, 128  }
  0xf6   : > { %1834 = vsyncadd (%p2188_p6), %s417_s27, 4294967168  ;;  %p2422_p4 = scmp.eq.s32.totalorder %s1966_s19, 0 }
  0xf8   : > { %1836 = dma.done.wait (%p2422_p4), [#allocation6], 1040   ;;  %p2423_p10 = pmov %p2422_p4 }
  0xf9   : > { %p2424_p11 = pmov %p2422_p4 }
  0xfa   : > { %1838 = vsyncadd (%p2423_p10), [#allocation6], 4294966256 }
  0xfb   : > { %1840 = dma.done.wait (%p2424_p11), [#allocation9], 1040   ;;  %p2425_p8 = pmov %p2422_p4 }
  0xfc   : > { %p2426_p5 = pmov %p2422_p4 }
  0xfd   : > { %1842 = vsyncadd (%p2425_p8), [#allocation9], 4294966256 }
  0xfe   : > { %1844 = dma.done.wait (%p2426_p5), [#allocation12], 1040   ;;  %p2427_p7 = pmov %p2422_p4 }
  0xff   : > { %p2428_p6 = pmov %p2422_p4 }
 0x100   : > { %1846 = vsyncadd (%p2427_p7), [#allocation12], 4294966256 }
 0x101   : > { %1848 = dma.done.wait (%p2428_p6), [#allocation15], 1040   ;;  %p2429_p9 = pmov %p2422_p4 }
 0x102   : > { %v1886_v0 = vmov 0.0   ;;  %vm1887_vm0 = vmmov 0   ;;  %v1471_v1 = vld [vmem:[#allocation5] sm:$0xff]   ;;  %v1472_v2 = vld [vmem:[#allocation5 + $0x8] sm:$0xff]   ;;  %v1473_v3 = vld [vmem:[#allocation5 + $0x10] sm:$0xff]   ;;  %s486_s20 = scalar_lea.vmem [#allocation17], %s2248_s17 }
 0x103   : > { %1850 = vsyncadd (%p2429_p9), [#allocation15], 4294966256  ;;  %1255 = vmatprep.subr.bf16.mxu0 %v1886_v0  ;;  %1271 = vmatprep.mubr.msk.bf16.mxu0 %vm1887_vm0, %v1886_v0  ;;  %v1479_v4 = vld [vmem:[#allocation8] sm:$0xff]   ;;  %v1474_v5 = vld [vmem:[#allocation5 + $0x18] sm:$0xff]   ;;  %s2407_s26 = sshll.u32 %s1966_s19, 7  ;;  %s963_s21 = sshll.u32 %s486_s20, 4  ;;  %s964_s21 = int_to_ptr.vmem [resolvable:$true] %s963_s21 }
 0x104   : > { %1275 = vmatprep.subr.bf16.mxu1 %v1886_v0  ;;  %1291 = vmatprep.mubr.msk.bf16.mxu1 %vm1887_vm0, %v1886_v0  ;;  %v1480_v6 = vld [vmem:[#allocation8 + $0x8] sm:$0xff]   ;;  %v1475_v7 = vld [vmem:[#allocation5 + $0x20] sm:$0xff]   ;;  %v1481_v8 = vld [vmem:[#allocation8 + $0x10] sm:$0xff]   ;;  %s2430_s18 = sld [smem:[#allocation28_spill]]  ;;  %s945_s22 = scalar_lea.sflag [#allocation4], %s2245_s29 }
 0x105   : > { %1256 = vmatpush3.bf16.msra.mxu0 %v1471_v1  ;;  %1276 = vmatpush3.bf16.msra.mxu1 %v1479_v4  ;;  %v1476_v9 = vld [vmem:[#allocation5 + $0x28] sm:$0xff]   ;;  %v1482_v10 = vld [vmem:[#allocation8 + $0x18] sm:$0xff]   ;;  %v1477_v11 = vld [vmem:[#allocation5 + $0x30] sm:$0xff]   ;;  %s1759_s30 = scalar_lea.vmem %s964_s21, 128  ;;  %p2431_p1 = scmp.ne.s32.totalorder %s2418_s9, 0 }
 0x106   : > { %1257 = vmatprep.subr.bf16.mxu0 %v1886_v0  ;;  %1277 = vmatprep.subr.bf16.mxu1 %v1886_v0  ;;  %v1478_v12 = vld [vmem:[#allocation5 + $0x38] sm:$0xff]   ;;  %v1483_v15 = vld [vmem:[#allocation11] sm:$0xff]   ;;  %v1485_v17 = vld [vmem:[#allocation11 + $0x8] sm:$0xff]   ;;  %p1760_p12 = scmp.ne.s32.totalorder %s964_s21, %s1759_s30  ;;  %s1888_s12 = smov [#allocation17]  }
 0x107   : > { %v495_v13 = vld [vmem:[%s420_s10] sm:$0xff]  ;;  %v1484_v16 = vld [vmem:[#allocation8 + $0x20] sm:$0xff]   ;;  %v1179_v27 = vld [vmem:[#allocation7] ss:$0 sm:$0xff]  ;;  %s1763_s27 = sshll.u32 %s1888_s12, 4  ;;  %s1764_s27 = int_to_ptr.vmem [resolvable:$false] %s1763_s27 }
 0x108   : > { %v496_v14 = vpack.c.bf16 %v495_v13, %v495_v13  ;;  %v1486_v18 = vld [vmem:[#allocation8 + $0x28] sm:$0xff]   ;;  %v1487_v19 = vld [vmem:[#allocation11 + $0x10] sm:$0xff]   ;;  %v1489_v21 = vld [vmem:[#allocation11 + $0x18] sm:$0xff]   ;;  %p1761_p13 = pnand %p1760_p12, %p2431_p1  ;;  %s1765_s10 = scalar_lea.vmem %s1764_s27, 256 }
 0x109   : > { %1258 = vmatpush3.bf16.msra.mxu0 %v1472_v2  ;;  %1278 = vmatpush3.bf16.msra.mxu1 %v1480_v6  ;;  %v1488_v20 = vld [vmem:[#allocation8 + $0x30] sm:$0xff]   ;;  %v1490_v22 = vld [vmem:[#allocation8 + $0x38] sm:$0xff]   ;;  %v1491_v23 = vld [vmem:[#allocation11 + $0x20] sm:$0xff]   ;;  %p1766_p2 = scmp.lt.s32.totalorder %s964_s21, %s1764_s27  ;;  %p1767_p3 = scmp.lt.s32.totalorder %s1765_s10, %s1759_s30 }
 0x10a   : > { %1259 = vmatprep.subr.bf16.mxu0 %v1886_v0  ;;  %1279 = vmatprep.subr.bf16.mxu1 %v1886_v0  ;;  %v1492_v24 = vld [vmem:[#allocation11 + $0x28] sm:$0xff]   ;;  %v1493_v25 = vld [vmem:[#allocation11 + $0x30] sm:$0xff]   ;;  %v1494_v26 = vld [vmem:[#allocation11 + $0x38] sm:$0xff]   ;;  %s2321_s25 = scalar_lea.hbm %s2430_s18, %s2407_s26  ;;  %p1762_p0 = pneg %p1761_p13 }
 0x10b   : > { %v1495_v34 = vld [vmem:[#allocation14] sm:$0xff]   ;;  %v1496_v38 = vld [vmem:[#allocation14 + $0x8] sm:$0xff]   ;;  %v1497_v41 = vld [vmem:[#allocation14 + $0x10] sm:$0xff]   ;;  %p1768_p4 = por %p1767_p3, %p1766_p2 }
 0x10c   : > { %v1498_v46 = vld [vmem:[#allocation14 + $0x18] sm:$0xff]   ;;  %v1499_v47 = vld [vmem:[#allocation14 + $0x20] sm:$0xff]   ;;  %v1500_v48 = vld [vmem:[#allocation14 + $0x28] sm:$0xff]  }
 0x10d   : > { %1260 = vmatpush3.bf16.msra.mxu0 %v1473_v3  ;;  %1280 = vmatpush3.bf16.msra.mxu1 %v1481_v8  ;;  %v1501_v49 = vld [vmem:[#allocation14 + $0x30] sm:$0xff]   ;;  %v1502_v50 = vld [vmem:[#allocation14 + $0x38] sm:$0xff]   ;;  %p1769_p10 = pnand %p1768_p4, %p1762_p0 }
 0x10e   : > { %1261 = vmatprep.subr.bf16.mxu0 %v1886_v0  ;;  %1281 = vmatprep.subr.bf16.mxu1 %v1886_v0  ;;  %v1188_v51 = vld [vmem:[#allocation10] ss:$0 sm:$0xff]  ;;  %v746_v57 = vld [vmem:[#allocation13] sm:$0x1] }
 0x111   : > { %1262 = vmatpush3.bf16.msra.mxu0 %v1474_v5  ;;  %1282 = vmatpush3.bf16.msra.mxu1 %v1482_v10 }
 0x112   : > { %1263 = vmatprep.subr.bf16.mxu0 %v1886_v0  ;;  %1283 = vmatprep.subr.bf16.mxu1 %v1886_v0 }
 0x115   : > { %1264 = vmatpush3.bf16.msra.mxu0 %v1475_v7  ;;  %1284 = vmatpush3.bf16.msra.mxu1 %v1484_v16 }
 0x116   : > { %1265 = vmatprep.subr.bf16.mxu0 %v1886_v0  ;;  %1285 = vmatprep.subr.bf16.mxu1 %v1886_v0 }
 0x119   : > { %1266 = vmatpush3.bf16.msra.mxu0 %v1476_v9  ;;  %1286 = vmatpush3.bf16.msra.mxu1 %v1486_v18 }
 0x11a   : > { %1267 = vmatprep.subr.bf16.mxu0 %v1886_v0  ;;  %1287 = vmatprep.subr.bf16.mxu1 %v1886_v0 }
 0x11d   : > { %1268 = vmatpush3.bf16.msra.mxu0 %v1477_v11  ;;  %1288 = vmatpush3.bf16.msra.mxu1 %v1488_v20 }
 0x11e   : > { %1269 = vmatprep.subr.bf16.mxu0 %v1886_v0  ;;  %1289 = vmatprep.subr.bf16.mxu1 %v1886_v0 }
 0x121   : > { %1270 = vmatpush3.bf16.msra.mxu0 %v1478_v12  ;;  %1290 = vmatpush3.bf16.msra.mxu1 %v1490_v22 }
 0x122   : > { %1295 = vmatprep.subr.bf16.mxu0 %v1886_v0  ;;  %1315 = vmatprep.subr.bf16.mxu1 %v1886_v0 }
 0x124   : > { %1272 = vmatmul.mubr.bf16.vlgmr.msra.gmra.mrb[0].mxu0 %v496_v14 }
 0x125   : > { %1296 = vmatpush3.bf16.msra.mxu0 %v1483_v15  ;;  %1311 = vmatprep.mubr.msk.bf16.mxu0 %vm1887_vm0, %v1886_v0 }
 0x126   : > { %1297 = vmatprep.subr.bf16.mxu0 %v1886_v0 }
 0x129   : > { %1298 = vmatpush3.bf16.msra.mxu0 %v1485_v17 }
 0x12a   : > { %1299 = vmatprep.subr.bf16.mxu0 %v1886_v0 }
 0x12d   : > { %1300 = vmatpush3.bf16.msra.mxu0 %v1487_v19 }
 0x12e   : > { %1301 = vmatprep.subr.bf16.mxu0 %v1886_v0 }
 0x131   : > { %1302 = vmatpush3.bf16.msra.mxu0 %v1489_v21 }
 0x132   : > { %1303 = vmatprep.subr.bf16.mxu0 %v1886_v0 }
 0x135   : > { %1304 = vmatpush3.bf16.msra.mxu0 %v1491_v23 }
 0x136   : > { %1305 = vmatprep.subr.bf16.mxu0 %v1886_v0 }
 0x139   : > { %1306 = vmatpush3.bf16.msra.mxu0 %v1492_v24 }
 0x13a   : > { %1307 = vmatprep.subr.bf16.mxu0 %v1886_v0 }
 0x13d   : > { %1308 = vmatpush3.bf16.msra.mxu0 %v1493_v25 }
 0x13e   : > { %1309 = vmatprep.subr.bf16.mxu0 %v1886_v0 }
 0x141   : > { %1310 = vmatpush3.bf16.msra.mxu0 %v1494_v26 }
 0x1f7   : > { %v602_v28 = vpop.f32.mrb[0].mxu0 }
 0x1f8   : > { %v603_v29 = vadd.f32 %v1179_v27, %v602_v28  ;;  %v1273_v30 = vpop.f32.mrb[1].mxu0 }
 0x1f9   : > { %v605_v31 = vpop.f32.mrb[2].mxu0 }
 0x1fa   : > { %1503 = vtanh.f32 %v603_v29  ;;  %v1274_v32 = vpop.f32.mrb[3].mxu0 }
 0x204   : > { %v1504_v33 = vpop.eup %1503 }
 0x205   : > { %v609_v35 = vpack.c.bf16 %v1504_v33, %v1504_v33  ;;  %v722_v36 = vrot.slane %v1504_v33, 4 }
 0x207   : > { %1292 = vmatmul.mubr.bf16.vlgmr.msra.gmra.mrb[0].mxu1 %v609_v35  ;;  %v723_v37 = vadd.f32 %v1504_v33, %v722_v36 }
 0x208   : > { %1316 = vmatpush3.bf16.msra.mxu1 %v1495_v34  ;;  %1331 = vmatprep.mubr.msk.bf16.mxu1 %vm1887_vm0, %v1886_v0 }
 0x209   : > { %v724_v39 = vrot.slane %v723_v37, 2  ;;  %1317 = vmatprep.subr.bf16.mxu1 %v1886_v0 }
 0x20b   : > { %v725_v40 = vadd.f32 %v724_v39, %v723_v37 }
 0x20c   : > { %1318 = vmatpush3.bf16.msra.mxu1 %v1496_v38 }
 0x20d   : > { %v726_v42 = vrot.slane %v725_v40, 1  ;;  %1319 = vmatprep.subr.bf16.mxu1 %v1886_v0 }
 0x20f   : > { %v727_v43 = vadd.f32 %v726_v42, %v725_v40 }
 0x210   : > { %1320 = vmatpush3.bf16.msra.mxu1 %v1497_v41 }
 0x211   : > { %v728_v44 = vmul.f32 0.125, %v727_v43  ;;  %1321 = vmatprep.subr.bf16.mxu1 %v1886_v0 }
 0x213   : > { %v729_v45 = vpack.c.bf16 %v728_v44, %v728_v44 }
 0x214   : > { %1322 = vmatpush3.bf16.msra.mxu1 %v1498_v46 }
 0x215   : > { %1312 = vmatmul.mubr.bf16.vlgmr.msra.gmra.mrb[4].mxu0 %v729_v45  ;;  %1323 = vmatprep.subr.bf16.mxu1 %v1886_v0 }
 0x218   : > { %1324 = vmatpush3.bf16.msra.mxu1 %v1499_v47 }
 0x219   : > { %1325 = vmatprep.subr.bf16.mxu1 %v1886_v0 }
 0x21c   : > { %1326 = vmatpush3.bf16.msra.mxu1 %v1500_v48 }
 0x21d   : > { %1327 = vmatprep.subr.bf16.mxu1 %v1886_v0 }
 0x220   : > { %1328 = vmatpush3.bf16.msra.mxu1 %v1501_v49 }
 0x221   : > { %1329 = vmatprep.subr.bf16.mxu1 %v1886_v0 }
 0x224   : > { %1330 = vmatpush3.bf16.msra.mxu1 %v1502_v50 }
 0x2da   : > { %v715_v52 = vpop.f32.mrb[0].mxu1 }
 0x2db   : > { %v716_v53 = vadd.f32 %v1188_v51, %v715_v52  ;;  %v1293_v54 = vpop.f32.mrb[1].mxu1 }
 0x2dc   : > { %v718_v55 = vpop.f32.mrb[2].mxu1 }
 0x2dd   : > { %721 = vst [vmem:[%s486_s20] sm:$0xff] %v716_v53  ;;  %v1294_v56 = vpop.f32.mrb[3].mxu1 }
 0x2e8   : > { %v829_v58 = vpop.f32.mrb[4].mxu0 }
 0x2e9   : > { %v830_v59 = vadd.f32 %v829_v58, %v746_v57  ;;  %v1313_v60 = vpop.f32.mrb[5].mxu0 }
 0x2ea   : > { %v832_v61 = vpop.f32.mrb[6].mxu0 }
 0x2eb   : > { %v835_v62 = vpack.c.bf16 %v830_v59, %v830_v59  ;;  %v1314_v63 = vpop.f32.mrb[7].mxu0 }
 0x2ed   : > { %1332 = vmatmul.mubr.bf16.vlgmr.msra.gmra.mrb[4].mxu1 %v835_v62 }
 0x2ee   : > { %1772 = shalt.err (!%p1769_p10)
}
 0x2ef   : > { %s1773_s20 = scalar_lea.hbm %s2321_s25, 128  ;;  %s1777_s12 = scalar_lea.hbm %s2430_s18, 256 }
 0x2f0   : > { %p1774_p11 = scmp.ne.s32.totalorder %s2321_s25, %s1773_s20  ;;  %p1778_p7 = scmp.lt.u32.totalorder %s2321_s25, %s2430_s18 }
 0x2f1   : > { %p1779_p6 = scmp.lt.u32.totalorder %s1777_s12, %s1773_s20  ;;  %p1781_p12 = scmp.lt.u32.totalorder %s1773_s20, %s2321_s25 }
 0x2f2   : > { %p1775_p8 = pnand %p1774_p11, %p2431_p1 }
 0x2f3   : > { %p1780_p9 = por %p1779_p6, %p1778_p7 }
 0x2f4   : > { %p1776_p5 = pneg %p1775_p8 }
 0x2f5   : > { %p1782_p13 = por %p1781_p12, %p1780_p9 }
 0x2f7   : > { %p1783_p0 = pnand %p1782_p13, %p1776_p5 }
 0x2f9   : > { %1786 = shalt.err (!%p1783_p0)
}
 0x2fa   : > { %1369 = dma.vmem_to_hbm [thread:$0]  (%p2431_p1), %s964_s21, 128, %s2321_s25, %s945_s22   ;;  %v852_v0 = vld [vmem:[#allocation16] sm:$0x1]  ;;  %vm941_vm1 = vcmask 1040384  }
 0x2fb   : > { %s493_s30 = scalar_lea.vmem [#allocation18], %s2248_s17  ;;  %s2432_s26 = sshll.u32 %s1966_s19, 7 }
 0x2fc   : > { %s976_s10 = sshll.u32 %s493_s30, 4  ;;  %s2433_s11 = sld [smem:[#allocation29_spill]]  ;;  %s2349_s10 = int_to_ptr.vmem [resolvable:$true] %s976_s10 }
 0x2fd   : > { %s950_s17 = scalar_lea.sflag [#allocation19], %s2245_s29  ;;  %s1787_s21 = scalar_lea.vmem %s2349_s10, 128 }
 0x2fe   : > { %p1788_p2 = scmp.ne.s32.totalorder %s2349_s10, %s1787_s21  ;;  %s1889_s19 = smov [#allocation18]  }
 0x2ff   : > { %s1791_s25 = sshll.u32 %s1889_s19, 4  ;;  %s1792_s25 = int_to_ptr.vmem [resolvable:$false] %s1791_s25 }
 0x300   : > { %p1789_p3 = pnand %p1788_p2, %p2431_p1  ;;  %s1793_s22 = scalar_lea.vmem %s1792_s25, 256 }
 0x301   : > { %p1794_p10 = scmp.lt.s32.totalorder %s2349_s10, %s1792_s25  ;;  %p1795_p11 = scmp.lt.s32.totalorder %s1793_s22, %s1787_s21 }
 0x302   : > { %s2347_s12 = scalar_lea.hbm %s2433_s11, %s2432_s26  ;;  %p1790_p4 = pneg %p1789_p3 }
 0x303   : > { %p1796_p8 = por %p1795_p11, %p1794_p10 }
 0x305   : > { %p1797_p5 = pnand %p1796_p8, %p1790_p4 }
 0x3c0   : > { %v935_v1 = vpop.f32.mrb[4].mxu1 }
 0x3c1   : > { %v936_v2 = vadd.f32 %v935_v1, %v852_v0  ;;  %v1333_v3 = vpop.f32.mrb[5].mxu1 }
 0x3c2   : > { %v938_v4 = vpop.f32.mrb[6].mxu1 }
 0x3c3   : > { %v942_v5 = vsel %vm941_vm1, %v936_v2, 0.0  ;;  %v1334_v6 = vpop.f32.mrb[7].mxu1 }
 0x3c4   : > { %943 = vst [vmem:[%s493_s30] sm:$0xff] %v942_v5 }
 0x3c5   : > { %1800 = shalt.err (!%p1797_p5)
}
 0x3c6   : > { %s1801_s29 = scalar_lea.hbm %s2347_s12, 128  ;;  %s1805_s26 = scalar_lea.hbm %s2433_s11, 256 }
 0x3c7   : > { %p1802_p7 = scmp.ne.s32.totalorder %s2347_s12, %s1801_s29  ;;  %p1806_p12 = scmp.lt.u32.totalorder %s2347_s12, %s2433_s11 }
 0x3c8   : > { %p1807_p13 = scmp.lt.u32.totalorder %s1805_s26, %s1801_s29  ;;  %p1809_p2 = scmp.lt.u32.totalorder %s1801_s29, %s2347_s12 }
 0x3c9   : > { %p1803_p6 = pnand %p1802_p7, %p2431_p1 }
 0x3ca   : > { %p1808_p0 = por %p1807_p13, %p1806_p12 }
 0x3cb   : > { %p1804_p9 = pneg %p1803_p6 }
 0x3cc   : > { %p1810_p3 = por %p1809_p2, %p1808_p0 }
 0x3ce   : > { %p1811_p4 = pnand %p1810_p3, %p1804_p9 }
 0x3d0   : > { %1814 = shalt.err (!%p1811_p4)
}
 0x3d1   : > { %1370 = dma.vmem_to_hbm [thread:$0]  (%p2431_p1), %s2349_s10, 128, %s2347_s12, %s950_s17  }
 0x3d2 PF: > { %s988_s21 = sand.u32 1, %s1861_s13   ;;  %p2434_p10 = scmp.ne.s32.totalorder %s2419_s28, 0 }
 0x3d3   : > { %p2435_p11 = scmp.ge.s32.totalorder %s1873_s16, 2  ;;  %s989_s19 = scalar_lea.sflag [#allocation4], %s988_s21 }
 0x3d5   : > { %p1403_p8 = pnand %p2435_p11, %p2434_p10 }
 0x3d7   : > { %1852 = dma.done.wait (!%p1403_p8), %s989_s19, 128  }
 0x3d8   : > { %1854 = vsyncadd (!%p1403_p8), %s989_s19, 4294967168  ;;  %s998_s25 = scalar_lea.sflag [#allocation19], %s988_s21 }
 0x3d9   : > { %1856 = dma.done.wait (!%p1403_p8), %s998_s25, 128  }
 0x3da   : > { %1858 = vsyncadd (!%p1403_p8), %s998_s25, 4294967168  ;;  %p31_p1 = scmp.ge.s32.totalorder %s2169_s23, 4   ;;  %s2436_s13 = smov %s1865_s14 }
 0x3db   : > { %s2437_s14 = smov %s1869_s15  ;;  %s2438_s15 = smov %s2180_s24 }
 0x3dc   : > { %s2439_s16 = smov %s2169_s23  ;;  %33 = sbr.rel (!%p31_p1) target bundleno = 15 (0xf), region = 150 }
 0x3e3   :  { %1003 = vsyncpa [#allocation3], 1 }
 0x3e4   :  { %1005 = vsyncpa [#allocation3 + $0x1], 1 }
 0x3e5   :  { %1006 = vsyncpa [#allocation6], 1 }
 0x3e6   :  { %1007 = vsyncpa [#allocation9], 1 }
 0x3e7   :  { %1008 = vsyncpa [#allocation12], 1 }
 0x3e8   :  { %1009 = vsyncpa [#allocation15], 1 }
 0x3e9   :  { %1010 = vsyncpa [#allocation4], 1 }
 0x3ea   :  { %1012 = vsyncpa [#allocation4 + $0x1], 1 }
 0x3eb   :  { %1013 = vsyncpa [#allocation19], 1 }
 0x3ec   :  { %1015 = vsyncpa [#allocation19 + $0x1], 1 }

// kernel: tpu_custom_call.1
= control target key start
LH: loop header
LB: loop body
LE: loop exit
PB: predicated region body
PF: predicated region fallthrough
CT: control target
= control target key end

     0   :  { %s2391_s0 = inlined_call_operand.hbm [shape: f32[16,128], index: 0, kind: input, shape index: {}]   ;;  %s2392_s1 = inlined_call_operand.hbm [shape: bf16[128,128], index: 1, kind: input, shape index: {}]   ;;  %s2393_s2 = inlined_call_operand.hbm [shape: f32[1,128], index: 2, kind: input, shape index: {}]   ;;  %s2394_s3 = inlined_call_operand.hbm [shape: bf16[128,128], index: 3, kind: input, shape index: {}]   ;;  %s2395_s4 = inlined_call_operand.hbm [shape: f32[1,128], index: 4, kind: input, shape index: {}]   ;;  %s2396_s5 = inlined_call_operand.hbm [shape: bf16[128,128], index: 5, kind: input, shape index: {}]   ;;  %s2397_s6 = inlined_call_operand.hbm [shape: f32[1,128], index: 6, kind: input, shape index: {}]   ;;  %s2398_s7 = inlined_call_operand.hbm [shape: bf16[128,128], index: 7, kind: input, shape index: {}]   ;;  %s2399_s8 = inlined_call_operand.hbm [shape: f32[1,128], index: 8, kind: input, shape index: {}]   ;;  %s2400_s9 = inlined_call_operand.hbm [shape: f32[16,128], index: 9, kind: output, shape index: {0}]   ;;  %s2401_s10 = inlined_call_operand.hbm [shape: f32[16,128], index: 10, kind: output, shape index: {1}]  }
   0x1   :  { %2408 = sst [smem:[#allocation27_spill]] %s2392_s1 }
   0x2   :  { %2409 = sst [smem:[#allocation28_spill]] %s2400_s9 }
   0x3   :  { %2410 = sst [smem:[#allocation29_spill]] %s2401_s10 }
   0x4   :  { %16 = vsyncpa [#allocation3], 0 }
   0x5   :  { %18 = vsyncpa [#allocation3 + $0x1], 0 }
   0x6   :  { %19 = vsyncpa [#allocation6], 0 }
   0x7   :  { %20 = vsyncpa [#allocation9], 0 }
   0x8   :  { %21 = vsyncpa [#allocation12], 0 }
   0x9   :  { %22 = vsyncpa [#allocation15], 0 }
   0xa   :  { %23 = vsyncpa [#allocation4], 0 }
   0xb   :  { %25 = vsyncpa [#allocation4 + $0x1], 0 }
   0xc   :  { %26 = vsyncpa [#allocation19], 0 }
   0xd   :  { %28 = vsyncpa [#allocation19 + $0x1], 0  ;;  %s1945_s13 = smov 0   ;;  %s1947_s14 = smov 0  }
   0xe   :  { %s1949_s15 = smov 0   ;;  %s1951_s16 = smov 0  }
   0xf LB: > { %s1875_s17 = smov [#allocation5]   ;;  %s1966_s19 = sadd.s32 4294967295, %s1873_s16   ;;  %s1873_s16 = sphi %s1951_s16, %s2439_s16   ;;  %s1869_s15 = sphi %s1949_s15, %s2438_s15   ;;  %s1865_s14 = sphi %s1947_s14, %s2437_s14   ;;  %s1861_s13 = sphi %s1945_s13, %s2436_s13  }
  0x10   : > { %s297_s18 = sshll.u32 %s1875_s17, 4  ;;  %p1155_p0 = scmp.ge.s32.totalorder %s1873_s16, 1  ;;  %s1971_s18 = int_to_ptr.vmem [resolvable:$true] %s297_s18 }
  0x11   : > { %p2404_p1 = scmp.eq.s32.totalorder %s1966_s19, 0  ;;  %p285_p2 = scmp.lt.s32.totalorder %s1873_s16, 3 }
  0x12   : > { %s1876_s21 = smov [#allocation8]   ;;  %s1877_s24 = smov [#allocation11]  }
  0x13   : > { %p1973_p3 = pnand %p1155_p0, %p285_p2  ;;  %s321_s22 = sshll.u32 %s1876_s21, 4  ;;  %s1986_s22 = int_to_ptr.vmem [resolvable:$true] %s321_s22 }
  0x14   : > { %s345_s25 = sshll.u32 %s1877_s24, 4  ;;  %s2413_s1 = sld [smem:[#allocation27_spill]]  ;;  %s1988_s25 = int_to_ptr.vmem [resolvable:$true] %s345_s25 }
  0x15   : > { %s2411_s20 = scalar_select %p1973_p3, 1, 0 }
  0x16   : > { %p1373_p5 = pneg %p1973_p3 }
  0x18   : > { %p1982_p6 = pnand %p1373_p5, %p2404_p1 }
  0x1a   : > { %s1505_s28 = scalar_lea.hbm %s2413_s1, 1024  ;;  %p1998_p8 = pneg %p1982_p6 }
  0x1b   : > { %p1506_p7 = scmp.ne.s32.totalorder %s2413_s1, %s1505_s28  ;;  %p1512_p11 = scmp.lt.u32.totalorder %s1505_s28, %s2413_s1 }
  0x1d   : > { %p1508_p9 = pnand %p1998_p8, %p1506_p7 }
  0x1f   : > { %p1509_p10 = pneg %p1508_p9 }
  0x21   : > { %p1514_p12 = pnand %p1512_p11, %p1509_p10 }
  0x23   : > { %1517 = shalt.err (!%p1514_p12)
}
  0x24   : > { %s1518_s21 = scalar_lea.vmem %s1971_s18, 1024  ;;  %p1526_p5 = scmp.lt.s32.totalorder %s1971_s18, %s1971_s18 }
  0x25   : > { %p1519_p13 = scmp.ne.s32.totalorder %s1971_s18, %s1518_s21  ;;  %p1527_p4 = scmp.lt.s32.totalorder %s1518_s21, %s1518_s21 }
  0x27   : > { %p1521_p0 = pnand %p1519_p13, %p1998_p8  ;;  %p1528_p7 = por %p1527_p4, %p1526_p5 }
  0x29   : > { %p1522_p2 = pneg %p1521_p0 }
  0x2b   : > { %p1529_p9 = pnand %p1528_p7, %p1522_p2 }
  0x2d   : > { %1532 = shalt.err (!%p1529_p9)
}
  0x2e   : > { %s1878_s24 = smov 64   ;;  %s1879_s26 = smov 4  }
  0x2f   : > { %1376 = dma.hbm_to_vmem [thread:$0]  (!%p1982_p6), %s2413_s1, 1024, %s1971_s18, [#allocation6], %s1878_s24, %s1878_s24, %s1879_s26  }
  0x30   : > { %s1533_s12 = scalar_lea.hbm %s2394_s3, 1024 }
  0x31   : > { %p1534_p4 = scmp.ne.s32.totalorder %s2394_s3, %s1533_s12  ;;  %p1540_p12 = scmp.lt.u32.totalorder %s1533_s12, %s2394_s3 }
  0x33   : > { %p1536_p10 = pnand %p1534_p4, %p1998_p8 }
  0x35   : > { %p1537_p11 = pneg %p1536_p10 }
  0x37   : > { %p1542_p13 = pnand %p1540_p12, %p1537_p11 }
  0x39   : > { %1545 = shalt.err (!%p1542_p13)
}
  0x3a   : > { %s1546_s18 = scalar_lea.vmem %s1986_s22, 1024  ;;  %p1554_p7 = scmp.lt.s32.totalorder %s1986_s22, %s1986_s22 }
  0x3b   : > { %p1547_p0 = scmp.ne.s32.totalorder %s1986_s22, %s1546_s18  ;;  %p1555_p9 = scmp.lt.s32.totalorder %s1546_s18, %s1546_s18 }
  0x3d   : > { %p1549_p2 = pnand %p1547_p0, %p1998_p8  ;;  %p1556_p4 = por %p1555_p9, %p1554_p7 }
  0x3f   : > { %p1550_p5 = pneg %p1549_p2 }
  0x41   : > { %p1557_p10 = pnand %p1556_p4, %p1550_p5 }
  0x43   : > { %1560 = shalt.err (!%p1557_p10)
}
  0x44   : > { %1382 = dma.hbm_to_vmem [thread:$0]  (!%p1982_p6), %s2394_s3, 1024, %s1986_s22, [#allocation9], %s1878_s24, %s1878_s24, %s1879_s26  }
  0x45   : > { %s1561_s29 = scalar_lea.hbm %s2396_s5, 1024 }
  0x46   : > { %p1562_p11 = scmp.ne.s32.totalorder %s2396_s5, %s1561_s29  ;;  %p1568_p0 = scmp.lt.u32.totalorder %s1561_s29, %s2396_s5 }
  0x48   : > { %p1564_p12 = pnand %p1562_p11, %p1998_p8 }
  0x4a   : > { %p1565_p13 = pneg %p1564_p12 }
  0x4c   : > { %p1570_p2 = pnand %p1568_p0, %p1565_p13 }
  0x4e   : > { %1573 = shalt.err (!%p1570_p2)
}
  0x4f   : > { %s1574_s22 = scalar_lea.vmem %s1988_s25, 1024  ;;  %p1582_p4 = scmp.lt.s32.totalorder %s1988_s25, %s1988_s25 }
  0x50   : > { %p1575_p5 = scmp.ne.s32.totalorder %s1988_s25, %s1574_s22  ;;  %p1583_p10 = scmp.lt.s32.totalorder %s1574_s22, %s1574_s22 }
  0x52   : > { %p1577_p7 = pnand %p1575_p5, %p1998_p8  ;;  %p1584_p11 = por %p1583_p10, %p1582_p4 }
  0x54   : > { %p1578_p9 = pneg %p1577_p7 }
  0x56   : > { %p1585_p12 = pnand %p1584_p11, %p1578_p9 }
  0x58   : > { %1588 = shalt.err (!%p1585_p12)
}
  0x59   : > { %1388 = dma.hbm_to_vmem [thread:$0]  (!%p1982_p6), %s2396_s5, 1024, %s1988_s25, [#allocation12], %s1878_s24, %s1878_s24, %s1879_s26  }
  0x5a   : > { %s1880_s10 = smov [#allocation14]   ;;  %s1881_s28 = smov [#allocation7]  }
  0x5b   : > { %s369_s27 = sshll.u32 %s1880_s10, 4  ;;  %s311_s29 = sshll.u32 %s1881_s28, 4  ;;  %s370_s27 = int_to_ptr.vmem [resolvable:$true] %s369_s27  ;;  %s312_s29 = int_to_ptr.vmem [resolvable:$true] %s311_s29 }
  0x5c   : > { %s1589_s17 = scalar_lea.hbm %s2398_s7, 1024 }
  0x5d   : > { %p1590_p13 = scmp.ne.s32.totalorder %s2398_s7, %s1589_s17  ;;  %p1596_p5 = scmp.lt.u32.totalorder %s1589_s17, %s2398_s7 }
  0x5f   : > { %p1592_p0 = pnand %p1590_p13, %p1998_p8 }
  0x61   : > { %p1593_p2 = pneg %p1592_p0 }
  0x63   : > { %p1598_p7 = pnand %p1596_p5, %p1593_p2 }
  0x65   : > { %1601 = shalt.err (!%p1598_p7)
}
  0x66   : > { %s1602_s25 = scalar_lea.vmem %s370_s27, 1024  ;;  %p1610_p11 = scmp.lt.s32.totalorder %s370_s27, %s370_s27 }
  0x67   : > { %p1603_p9 = scmp.ne.s32.totalorder %s370_s27, %s1602_s25  ;;  %p1611_p12 = scmp.lt.s32.totalorder %s1602_s25, %s1602_s25 }
  0x69   : > { %p1605_p4 = pnand %p1603_p9, %p1998_p8  ;;  %p1612_p1 = por %p1611_p12, %p1610_p11 }
  0x6b   : > { %p1606_p10 = pneg %p1605_p4 }
  0x6d   : > { %p1613_p3 = pnand %p1612_p1, %p1606_p10 }
  0x6f   : > { %1616 = shalt.err (!%p1613_p3)
}
  0x70   : > { %1394 = dma.hbm_to_vmem [thread:$0]  (!%p1982_p6), %s2398_s7, 1024, %s370_s27, [#allocation15], %s1878_s24, %s1878_s24, %s1879_s26  }
  0x71   : > { %s1617_s30 = scalar_lea.hbm %s2393_s2, 16 }
  0x72   : > { %p1618_p1 = scmp.ne.s32.totalorder %s2393_s2, %s1617_s30  ;;  %p1624_p0 = scmp.lt.u32.totalorder %s1617_s30, %s2393_s2 }
  0x74   : > { %p1620_p3 = pnand %p1618_p1, %p1998_p8 }
  0x76   : > { %p1621_p13 = pneg %p1620_p3 }
  0x78   : > { %p1626_p2 = pnand %p1624_p0, %p1621_p13 }
  0x7a   : > { %1629 = shalt.err (!%p1626_p2)
}
  0x7b   : > { %s1630_s18 = scalar_lea.vmem %s312_s29, 16  ;;  %s1637_s24 = scalar_lea.vmem %s312_s29, 32 }
  0x7c   : > { %p1631_p5 = scmp.ne.s32.totalorder %s312_s29, %s1630_s18  ;;  %p1638_p4 = scmp.lt.s32.totalorder %s312_s29, %s312_s29 }
  0x7d   : > { %p1639_p10 = scmp.lt.s32.totalorder %s1637_s24, %s1630_s18 }
  0x7e   : > { %p1633_p7 = pnand %p1631_p5, %p1998_p8 }
  0x7f   : > { %p1640_p11 = por %p1639_p10, %p1638_p4 }
  0x80   : > { %p1634_p9 = pneg %p1633_p7 }
  0x82   : > { %p1641_p12 = pnand %p1640_p11, %p1634_p9 }
  0x84   : > { %1644 = shalt.err (!%p1641_p12)
}
  0x85   : > { %1379 = dma.hbm_to_vmem [thread:$0]  (!%p1982_p6), %s2393_s2, 16, %s312_s29, [#allocation6]  }
  0x86   : > { %s1882_s25 = smov [#allocation10]   ;;  %s1883_s9 = smov [#allocation13]  }
  0x87   : > { %s335_s1 = sshll.u32 %s1882_s25, 4  ;;  %s359_s10 = sshll.u32 %s1883_s9, 4  ;;  %s336_s1 = int_to_ptr.vmem [resolvable:$true] %s335_s1  ;;  %s360_s10 = int_to_ptr.vmem [resolvable:$true] %s359_s10 }
  0x88   : > { %s1645_s12 = scalar_lea.hbm %s2395_s4, 16 }
  0x89   : > { %p1646_p1 = scmp.ne.s32.totalorder %s2395_s4, %s1645_s12  ;;  %p1652_p0 = scmp.lt.u32.totalorder %s1645_s12, %s2395_s4 }
  0x8b   : > { %p1648_p3 = pnand %p1646_p1, %p1998_p8 }
  0x8d   : > { %p1649_p13 = pneg %p1648_p3 }
  0x8f   : > { %p1654_p2 = pnand %p1652_p0, %p1649_p13 }
  0x91   : > { %1657 = shalt.err (!%p1654_p2)
}
  0x92   : > { %s1658_s29 = scalar_lea.vmem %s336_s1, 16  ;;  %s1665_s24 = scalar_lea.vmem %s336_s1, 32 }
  0x93   : > { %p1659_p5 = scmp.ne.s32.totalorder %s336_s1, %s1658_s29  ;;  %p1666_p4 = scmp.lt.s32.totalorder %s336_s1, %s336_s1 }
  0x94   : > { %p1667_p10 = scmp.lt.s32.totalorder %s1665_s24, %s1658_s29 }
  0x95   : > { %p1661_p7 = pnand %p1659_p5, %p1998_p8 }
  0x96   : > { %p1668_p11 = por %p1667_p10, %p1666_p4 }
  0x97   : > { %p1662_p9 = pneg %p1661_p7 }
  0x99   : > { %p1669_p12 = pnand %p1668_p11, %p1662_p9 }
  0x9b   : > { %1672 = shalt.err (!%p1669_p12)
}
  0x9c   : > { %1385 = dma.hbm_to_vmem [thread:$0]  (!%p1982_p6), %s2395_s4, 16, %s336_s1, [#allocation9]  }
  0x9d   : > { %s1673_s28 = scalar_lea.hbm %s2397_s6, 16 }
  0x9e   : > { %p1674_p1 = scmp.ne.s32.totalorder %s2397_s6, %s1673_s28  ;;  %p1680_p0 = scmp.lt.u32.totalorder %s1673_s28, %s2397_s6 }
  0xa0   : > { %p1676_p3 = pnand %p1674_p1, %p1998_p8 }
  0xa2   : > { %p1677_p13 = pneg %p1676_p3 }
  0xa4   : > { %p1682_p2 = pnand %p1680_p0, %p1677_p13 }
  0xa6   : > { %1685 = shalt.err (!%p1682_p2)
}
  0xa7   : > { %s1686_s22 = scalar_lea.vmem %s360_s10, 16  ;;  %s1693_s1 = scalar_lea.vmem %s360_s10, 32 }
  0xa8   : > { %p1687_p5 = scmp.ne.s32.totalorder %s360_s10, %s1686_s22  ;;  %p1694_p4 = scmp.lt.s32.totalorder %s360_s10, %s360_s10 }
  0xa9   : > { %p1695_p10 = scmp.lt.s32.totalorder %s1693_s1, %s1686_s22 }
  0xaa   : > { %p1689_p7 = pnand %p1687_p5, %p1998_p8 }
  0xab   : > { %p1696_p11 = por %p1695_p10, %p1694_p4 }
  0xac   : > { %p1690_p9 = pneg %p1689_p7 }
  0xae   : > { %p1697_p12 = pnand %p1696_p11, %p1690_p9 }
  0xb0   : > { %1700 = shalt.err (!%p1697_p12)
}
  0xb1   : > { %1391 = dma.hbm_to_vmem [thread:$0]  (!%p1982_p6), %s2397_s6, 16, %s360_s10, [#allocation12]  }
  0xb2   : > { %s1884_s24 = smov [#allocation16]   ;;  %s1701_s9 = scalar_lea.hbm %s2399_s8, 16 }
  0xb3   : > { %s383_s26 = sshll.u32 %s1884_s24, 4  ;;  %p1702_p1 = scmp.ne.s32.totalorder %s2399_s8, %s1701_s9  ;;  %s384_s26 = int_to_ptr.vmem [resolvable:$true] %s383_s26 }
  0xb4   : > { %p1708_p0 = scmp.lt.u32.totalorder %s1701_s9, %s2399_s8 }
  0xb5   : > { %p1704_p3 = pnand %p1702_p1, %p1998_p8 }
  0xb7   : > { %p1705_p13 = pneg %p1704_p3 }
  0xb9   : > { %p1710_p2 = pnand %p1708_p0, %p1705_p13 }
  0xbb   : > { %1713 = shalt.err (!%p1710_p2)
}
  0xbc   : > { %s1714_s10 = scalar_lea.vmem %s384_s26, 16  ;;  %s1721_s21 = scalar_lea.vmem %s384_s26, 32 }
  0xbd   : > { %p1715_p5 = scmp.ne.s32.totalorder %s384_s26, %s1714_s10  ;;  %p1722_p4 = scmp.lt.s32.totalorder %s384_s26, %s384_s26 }
  0xbe   : > { %p1723_p10 = scmp.lt.s32.totalorder %s1721_s21, %s1714_s10 }
  0xbf   : > { %p1717_p7 = pnand %p1715_p5, %p1998_p8 }
  0xc0   : > { %p1724_p11 = por %p1723_p10, %p1722_p4 }
  0xc1   : > { %p1718_p9 = pneg %p1717_p7 }
  0xc3   : > { %p1725_p12 = pnand %p1724_p11, %p1718_p9 }
  0xc5   : > { %1728 = shalt.err (!%p1725_p12)
}
  0xc6   : > { %1397 = dma.hbm_to_vmem [thread:$0]  (!%p1982_p6), %s2399_s8, 16, %s384_s26, [#allocation15]  }
  0xc7   : > { %s1154_s11 = sadd.s32 4294967294, %s1873_s16   ;;  %s2169_s23 = sadd.s32 1, %s1873_s16  }
  0xc8   : > { %s38_s18 = ssub.s32 %s1873_s16, %s2169_s23  ;;  %s41_s29 = sadd.s32 1, %s1869_s15 }
  0xc9   : > { %p39_p8 = scmp.eq.s32.totalorder %s38_s18, 0  ;;  %p48_p1 = scmp.ne.s32.totalorder %s1869_s15, %s1865_s14 }
  0xca   : > { %p49_p3 = scmp.eq.s32.totalorder %s1873_s16, 0  ;;  %p54_p13 = scmp.ne.s32.totalorder %s1865_s14, %s1861_s13 }
  0xcb   : > { %s2180_s24 = scalar_select %p39_p8, %s1869_s15, %s41_s29  }
  0xcc   : > { %p2182_p0 = por %p49_p3, %p48_p1  ;;  %p2416_p2 = scmp.eq.s32.totalorder %s1966_s19, 0 }
  0xcd   : > { %p246_p5 = scmp.eq.s32.totalorder %s1966_s19, 1  ;;  %p252_p7 = scmp.eq.s32.totalorder %s1154_s11, 1 }
  0xce   : > { %p2188_p6 = por %p2416_p2, %p54_p13  ;;  %p1417_p9 = scmp.lt.s32.totalorder %s1873_s16, 2 }
  0xcf   : > { %s394_s25 = sand.u32 1, %s1869_s15   ;;  %p2195_p4 = por %p246_p5, %p48_p1 }
  0xd0   : > { %p2199_p10 = por %p252_p7, %p54_p13  ;;  %s1165_s30 = sshll.u32 %s394_s25, 3 }
  0xd1   : > { %s2418_s9 = scalar_select %p2195_p4, 1, 0 }
  0xd2   : > { %s2419_s28 = scalar_select %p2199_p10, 1, 0 }
  0xd3   : > { %s1166_s12 = sshll.u32 %s1873_s16, 7  ;;  %s398_s22 = scalar_lea.vmem [#allocation2], %s1165_s30 }
  0xd4   : > { %s2207_s21 = scalar_lea.hbm %s2391_s0, %s1166_s12  ;;  %s405_s1 = sshll.u32 %s398_s22, 4  ;;  %s2209_s1 = int_to_ptr.vmem [resolvable:$true] %s405_s1 }
  0xd5   : > { %p2213_p11 = pnand %p1417_p9, %p2182_p0  ;;  %s395_s18 = scalar_lea.sflag [#allocation3], %s394_s25 }
  0xd6   : > { %s1729_s29 = scalar_lea.hbm %s2207_s21, 128  ;;  %s1734_s17 = scalar_lea.hbm %s2391_s0, 256 }
  0xd7   : > { %p1730_p12 = scmp.ne.s32.totalorder %s2207_s21, %s1729_s29  ;;  %p1731_p8 = pneg %p2213_p11 }
  0xd8   : > { %p1735_p13 = scmp.lt.u32.totalorder %s2207_s21, %s2391_s0  ;;  %p1736_p0 = scmp.lt.u32.totalorder %s1734_s17, %s1729_s29 }
  0xd9   : > { %p1732_p1 = pnand %p1731_p8, %p1730_p12  ;;  %p1738_p5 = scmp.lt.u32.totalorder %s1729_s29, %s2207_s21 }
  0xda   : > { %p1737_p2 = por %p1736_p0, %p1735_p13 }
  0xdb   : > { %p1733_p3 = pneg %p1732_p1 }
  0xdc   : > { %p1739_p7 = por %p1738_p5, %p1737_p2 }
  0xde   : > { %p1740_p9 = pnand %p1739_p7, %p1733_p3 }
  0xe0   : > { %1743 = shalt.err (!%p1740_p9)
}
  0xe1   : > { %s1744_s25 = scalar_lea.vmem %s2209_s1, 128  ;;  %s1885_s22 = smov [#allocation2]  }
  0xe2   : > { %p1745_p12 = scmp.ne.s32.totalorder %s2209_s1, %s1744_s25  ;;  %s1749_s30 = sshll.u32 %s1885_s22, 4  ;;  %s1750_s30 = int_to_ptr.vmem [resolvable:$false] %s1749_s30 }
  0xe3   : > { %s1751_s12 = scalar_lea.vmem %s1750_s30, 256  ;;  %p1752_p4 = scmp.lt.s32.totalorder %s2209_s1, %s1750_s30 }
  0xe4   : > { %p1747_p1 = pnand %p1745_p12, %p1731_p8  ;;  %p1753_p13 = scmp.lt.s32.totalorder %s1751_s12, %s1744_s25 }
  0xe6   : > { %p1748_p10 = pneg %p1747_p1  ;;  %p1754_p0 = por %p1753_p13, %p1752_p4 }
  0xe8   : > { %p1755_p2 = pnand %p1754_p0, %p1748_p10 }
  0xea   : > { %1758 = shalt.err (!%p1755_p2)
}
  0xeb   : > { %1401 = dma.hbm_to_vmem [thread:$0]  (!%p2213_p11), %s2207_s21, 128, %s2209_s1, %s395_s18  }
  0xec   : > { %p2421_p3 = scmp.ne.s32.totalorder %s2411_s20, 0 }
  0xed   : > { %s2245_s29 = sand.u32 (!%p2421_p3), 1, %s1865_s14  }
  0xee   : > { %414 = sbr.rel (%p2421_p3) target bundleno = 978 (0x3d2), region = 56  ;;  %s2248_s17 = sshll.u32 (!%p2421_p3), %s2245_s29, 3 }
  0xef   : > { %s417_s27 = scalar_lea.sflag (!%p2421_p3), [#allocation3], %s2245_s29  ;;  %s420_s10 = scalar_lea.vmem (!%p2421_p3), [#allocation2], %s2248_s17 }
  0xf5   : > { %1832 = dma.done.wait (%p2188_p6), %s417_s27, 128  }
  0xf6   : > { %1834 = vsyncadd (%p2188_p6), %s417_s27, 4294967168  ;;  %p2422_p4 = scmp.eq.s32.totalorder %s1966_s19, 0 }
  0xf8   : > { %1836 = dma.done.wait (%p2422_p4), [#allocation6], 1040   ;;  %p2423_p10 = pmov %p2422_p4 }
  0xf9   : > { %p2424_p11 = pmov %p2422_p4 }
  0xfa   : > { %1838 = vsyncadd (%p2423_p10), [#allocation6], 4294966256 }
  0xfb   : > { %1840 = dma.done.wait (%p2424_p11), [#allocation9], 1040   ;;  %p2425_p8 = pmov %p2422_p4 }
  0xfc   : > { %p2426_p5 = pmov %p2422_p4 }
  0xfd   : > { %1842 = vsyncadd (%p2425_p8), [#allocation9], 4294966256 }
  0xfe   : > { %1844 = dma.done.wait (%p2426_p5), [#allocation12], 1040   ;;  %p2427_p7 = pmov %p2422_p4 }
  0xff   : > { %p2428_p6 = pmov %p2422_p4 }
 0x100   : > { %1846 = vsyncadd (%p2427_p7), [#allocation12], 4294966256 }
 0x101   : > { %1848 = dma.done.wait (%p2428_p6), [#allocation15], 1040   ;;  %p2429_p9 = pmov %p2422_p4 }
 0x102   : > { %v1886_v0 = vmov 0.0   ;;  %vm1887_vm0 = vmmov 0   ;;  %v1471_v1 = vld [vmem:[#allocation5] sm:$0xff]   ;;  %v1472_v2 = vld [vmem:[#allocation5 + $0x8] sm:$0xff]   ;;  %v1473_v3 = vld [vmem:[#allocation5 + $0x10] sm:$0xff]   ;;  %s486_s20 = scalar_lea.vmem [#allocation17], %s2248_s17 }
 0x103   : > { %1850 = vsyncadd (%p2429_p9), [#allocation15], 4294966256  ;;  %1255 = vmatprep.subr.bf16.mxu0 %v1886_v0  ;;  %1271 = vmatprep.mubr.msk.bf16.mxu0 %vm1887_vm0, %v1886_v0  ;;  %v1479_v4 = vld [vmem:[#allocation8] sm:$0xff]   ;;  %v1474_v5 = vld [vmem:[#allocation5 + $0x18] sm:$0xff]   ;;  %s2407_s26 = sshll.u32 %s1966_s19, 7  ;;  %s963_s21 = sshll.u32 %s486_s20, 4  ;;  %s964_s21 = int_to_ptr.vmem [resolvable:$true] %s963_s21 }
 0x104   : > { %1275 = vmatprep.subr.bf16.mxu1 %v1886_v0  ;;  %1291 = vmatprep.mubr.msk.bf16.mxu1 %vm1887_vm0, %v1886_v0  ;;  %v1480_v6 = vld [vmem:[#allocation8 + $0x8] sm:$0xff]   ;;  %v1475_v7 = vld [vmem:[#allocation5 + $0x20] sm:$0xff]   ;;  %v1481_v8 = vld [vmem:[#allocation8 + $0x10] sm:$0xff]   ;;  %s2430_s18 = sld [smem:[#allocation28_spill]]  ;;  %s945_s22 = scalar_lea.sflag [#allocation4], %s2245_s29 }
 0x105   : > { %1256 = vmatpush3.bf16.msra.mxu0 %v1471_v1  ;;  %1276 = vmatpush3.bf16.msra.mxu1 %v1479_v4  ;;  %v1476_v9 = vld [vmem:[#allocation5 + $0x28] sm:$0xff]   ;;  %v1482_v10 = vld [vmem:[#allocation8 + $0x18] sm:$0xff]   ;;  %v1477_v11 = vld [vmem:[#allocation5 + $0x30] sm:$0xff]   ;;  %s1759_s30 = scalar_lea.vmem %s964_s21, 128  ;;  %p2431_p1 = scmp.ne.s32.totalorder %s2418_s9, 0 }
 0x106   : > { %1257 = vmatprep.subr.bf16.mxu0 %v1886_v0  ;;  %1277 = vmatprep.subr.bf16.mxu1 %v1886_v0  ;;  %v1478_v12 = vld [vmem:[#allocation5 + $0x38] sm:$0xff]   ;;  %v1483_v15 = vld [vmem:[#allocation11] sm:$0xff]   ;;  %v1485_v17 = vld [vmem:[#allocation11 + $0x8] sm:$0xff]   ;;  %p1760_p12 = scmp.ne.s32.totalorder %s964_s21, %s1759_s30  ;;  %s1888_s12 = smov [#allocation17]  }
 0x107   : > { %v495_v13 = vld [vmem:[%s420_s10] sm:$0xff]  ;;  %v1484_v16 = vld [vmem:[#allocation8 + $0x20] sm:$0xff]   ;;  %v1179_v27 = vld [vmem:[#allocation7] ss:$0 sm:$0xff]  ;;  %s1763_s27 = sshll.u32 %s1888_s12, 4  ;;  %s1764_s27 = int_to_ptr.vmem [resolvable:$false] %s1763_s27 }
 0x108   : > { %v496_v14 = vpack.c.bf16 %v495_v13, %v495_v13  ;;  %v1486_v18 = vld [vmem:[#allocation8 + $0x28] sm:$0xff]   ;;  %v1487_v19 = vld [vmem:[#allocation11 + $0x10] sm:$0xff]   ;;  %v1489_v21 = vld [vmem:[#allocation11 + $0x18] sm:$0xff]   ;;  %p1761_p13 = pnand %p1760_p12, %p2431_p1  ;;  %s1765_s10 = scalar_lea.vmem %s1764_s27, 256 }
 0x109   : > { %1258 = vmatpush3.bf16.msra.mxu0 %v1472_v2  ;;  %1278 = vmatpush3.bf16.msra.mxu1 %v1480_v6  ;;  %v1488_v20 = vld [vmem:[#allocation8 + $0x30] sm:$0xff]   ;;  %v1490_v22 = vld [vmem:[#allocation8 + $0x38] sm:$0xff]   ;;  %v1491_v23 = vld [vmem:[#allocation11 + $0x20] sm:$0xff]   ;;  %p1766_p2 = scmp.lt.s32.totalorder %s964_s21, %s1764_s27  ;;  %p1767_p3 = scmp.lt.s32.totalorder %s1765_s10, %s1759_s30 }
 0x10a   : > { %1259 = vmatprep.subr.bf16.mxu0 %v1886_v0  ;;  %1279 = vmatprep.subr.bf16.mxu1 %v1886_v0  ;;  %v1492_v24 = vld [vmem:[#allocation11 + $0x28] sm:$0xff]   ;;  %v1493_v25 = vld [vmem:[#allocation11 + $0x30] sm:$0xff]   ;;  %v1494_v26 = vld [vmem:[#allocation11 + $0x38] sm:$0xff]   ;;  %s2321_s25 = scalar_lea.hbm %s2430_s18, %s2407_s26  ;;  %p1762_p0 = pneg %p1761_p13 }
 0x10b   : > { %v1495_v34 = vld [vmem:[#allocation14] sm:$0xff]   ;;  %v1496_v38 = vld [vmem:[#allocation14 + $0x8] sm:$0xff]   ;;  %v1497_v41 = vld [vmem:[#allocation14 + $0x10] sm:$0xff]   ;;  %p1768_p4 = por %p1767_p3, %p1766_p2 }
 0x10c   : > { %v1498_v46 = vld [vmem:[#allocation14 + $0x18] sm:$0xff]   ;;  %v1499_v47 = vld [vmem:[#allocation14 + $0x20] sm:$0xff]   ;;  %v1500_v48 = vld [vmem:[#allocation14 + $0x28] sm:$0xff]  }
 0x10d   : > { %1260 = vmatpush3.bf16.msra.mxu0 %v1473_v3  ;;  %1280 = vmatpush3.bf16.msra.mxu1 %v1481_v8  ;;  %v1501_v49 = vld [vmem:[#allocation14 + $0x30] sm:$0xff]   ;;  %v1502_v50 = vld [vmem:[#allocation14 + $0x38] sm:$0xff]   ;;  %p1769_p10 = pnand %p1768_p4, %p1762_p0 }
 0x10e   : > { %1261 = vmatprep.subr.bf16.mxu0 %v1886_v0  ;;  %1281 = vmatprep.subr.bf16.mxu1 %v1886_v0  ;;  %v1188_v51 = vld [vmem:[#allocation10] ss:$0 sm:$0xff]  ;;  %v746_v57 = vld [vmem:[#allocation13] sm:$0x1] }
 0x111   : > { %1262 = vmatpush3.bf16.msra.mxu0 %v1474_v5  ;;  %1282 = vmatpush3.bf16.msra.mxu1 %v1482_v10 }
 0x112   : > { %1263 = vmatprep.subr.bf16.mxu0 %v1886_v0  ;;  %1283 = vmatprep.subr.bf16.mxu1 %v1886_v0 }
 0x115   : > { %1264 = vmatpush3.bf16.msra.mxu0 %v1475_v7  ;;  %1284 = vmatpush3.bf16.msra.mxu1 %v1484_v16 }
 0x116   : > { %1265 = vmatprep.subr.bf16.mxu0 %v1886_v0  ;;  %1285 = vmatprep.subr.bf16.mxu1 %v1886_v0 }
 0x119   : > { %1266 = vmatpush3.bf16.msra.mxu0 %v1476_v9  ;;  %1286 = vmatpush3.bf16.msra.mxu1 %v1486_v18 }
 0x11a   : > { %1267 = vmatprep.subr.bf16.mxu0 %v1886_v0  ;;  %1287 = vmatprep.subr.bf16.mxu1 %v1886_v0 }
 0x11d   : > { %1268 = vmatpush3.bf16.msra.mxu0 %v1477_v11  ;;  %1288 = vmatpush3.bf16.msra.mxu1 %v1488_v20 }
 0x11e   : > { %1269 = vmatprep.subr.bf16.mxu0 %v1886_v0  ;;  %1289 = vmatprep.subr.bf16.mxu1 %v1886_v0 }
 0x121   : > { %1270 = vmatpush3.bf16.msra.mxu0 %v1478_v12  ;;  %1290 = vmatpush3.bf16.msra.mxu1 %v1490_v22 }
 0x122   : > { %1295 = vmatprep.subr.bf16.mxu0 %v1886_v0  ;;  %1315 = vmatprep.subr.bf16.mxu1 %v1886_v0 }
 0x124   : > { %1272 = vmatmul.mubr.bf16.vlgmr.msra.gmra.mrb[0].mxu0 %v496_v14 }
 0x125   : > { %1296 = vmatpush3.bf16.msra.mxu0 %v1483_v15  ;;  %1311 = vmatprep.mubr.msk.bf16.mxu0 %vm1887_vm0, %v1886_v0 }
 0x126   : > { %1297 = vmatprep.subr.bf16.mxu0 %v1886_v0 }
 0x129   : > { %1298 = vmatpush3.bf16.msra.mxu0 %v1485_v17 }
 0x12a   : > { %1299 = vmatprep.subr.bf16.mxu0 %v1886_v0 }
 0x12d   : > { %1300 = vmatpush3.bf16.msra.mxu0 %v1487_v19 }
 0x12e   : > { %1301 = vmatprep.subr.bf16.mxu0 %v1886_v0 }
 0x131   : > { %1302 = vmatpush3.bf16.msra.mxu0 %v1489_v21 }
 0x132   : > { %1303 = vmatprep.subr.bf16.mxu0 %v1886_v0 }
 0x135   : > { %1304 = vmatpush3.bf16.msra.mxu0 %v1491_v23 }
 0x136   : > { %1305 = vmatprep.subr.bf16.mxu0 %v1886_v0 }
 0x139   : > { %1306 = vmatpush3.bf16.msra.mxu0 %v1492_v24 }
 0x13a   : > { %1307 = vmatprep.subr.bf16.mxu0 %v1886_v0 }
 0x13d   : > { %1308 = vmatpush3.bf16.msra.mxu0 %v1493_v25 }
 0x13e   : > { %1309 = vmatprep.subr.bf16.mxu0 %v1886_v0 }
 0x141   : > { %1310 = vmatpush3.bf16.msra.mxu0 %v1494_v26 }
 0x1f7   : > { %v602_v28 = vpop.f32.mrb[0].mxu0 }
 0x1f8   : > { %v603_v29 = vadd.f32 %v1179_v27, %v602_v28  ;;  %v1273_v30 = vpop.f32.mrb[1].mxu0 }
 0x1f9   : > { %v605_v31 = vpop.f32.mrb[2].mxu0 }
 0x1fa   : > { %1503 = vtanh.f32 %v603_v29  ;;  %v1274_v32 = vpop.f32.mrb[3].mxu0 }
 0x204   : > { %v1504_v33 = vpop.eup %1503 }
 0x205   : > { %v609_v35 = vpack.c.bf16 %v1504_v33, %v1504_v33  ;;  %v722_v36 = vrot.slane %v1504_v33, 4 }
 0x207   : > { %1292 = vmatmul.mubr.bf16.vlgmr.msra.gmra.mrb[0].mxu1 %v609_v35  ;;  %v723_v37 = vadd.f32 %v1504_v33, %v722_v36 }
 0x208   : > { %1316 = vmatpush3.bf16.msra.mxu1 %v1495_v34  ;;  %1331 = vmatprep.mubr.msk.bf16.mxu1 %vm1887_vm0, %v1886_v0 }
 0x209   : > { %v724_v39 = vrot.slane %v723_v37, 2  ;;  %1317 = vmatprep.subr.bf16.mxu1 %v1886_v0 }
 0x20b   : > { %v725_v40 = vadd.f32 %v724_v39, %v723_v37 }
 0x20c   : > { %1318 = vmatpush3.bf16.msra.mxu1 %v1496_v38 }
 0x20d   : > { %v726_v42 = vrot.slane %v725_v40, 1  ;;  %1319 = vmatprep.subr.bf16.mxu1 %v1886_v0 }
 0x20f   : > { %v727_v43 = vadd.f32 %v726_v42, %v725_v40 }
 0x210   : > { %1320 = vmatpush3.bf16.msra.mxu1 %v1497_v41 }
 0x211   : > { %v728_v44 = vmul.f32 0.125, %v727_v43  ;;  %1321 = vmatprep.subr.bf16.mxu1 %v1886_v0 }
 0x213   : > { %v729_v45 = vpack.c.bf16 %v728_v44, %v728_v44 }
 0x214   : > { %1322 = vmatpush3.bf16.msra.mxu1 %v1498_v46 }
 0x215   : > { %1312 = vmatmul.mubr.bf16.vlgmr.msra.gmra.mrb[4].mxu0 %v729_v45  ;;  %1323 = vmatprep.subr.bf16.mxu1 %v1886_v0 }
 0x218   : > { %1324 = vmatpush3.bf16.msra.mxu1 %v1499_v47 }
 0x219   : > { %1325 = vmatprep.subr.bf16.mxu1 %v1886_v0 }
 0x21c   : > { %1326 = vmatpush3.bf16.msra.mxu1 %v1500_v48 }
 0x21d   : > { %1327 = vmatprep.subr.bf16.mxu1 %v1886_v0 }
 0x220   : > { %1328 = vmatpush3.bf16.msra.mxu1 %v1501_v49 }
 0x221   : > { %1329 = vmatprep.subr.bf16.mxu1 %v1886_v0 }
 0x224   : > { %1330 = vmatpush3.bf16.msra.mxu1 %v1502_v50 }
 0x2da   : > { %v715_v52 = vpop.f32.mrb[0].mxu1 }
 0x2db   : > { %v716_v53 = vadd.f32 %v1188_v51, %v715_v52  ;;  %v1293_v54 = vpop.f32.mrb[1].mxu1 }
 0x2dc   : > { %v718_v55 = vpop.f32.mrb[2].mxu1 }
 0x2dd   : > { %721 = vst [vmem:[%s486_s20] sm:$0xff] %v716_v53  ;;  %v1294_v56 = vpop.f32.mrb[3].mxu1 }
 0x2e8   : > { %v829_v58 = vpop.f32.mrb[4].mxu0 }
 0x2e9   : > { %v830_v59 = vadd.f32 %v829_v58, %v746_v57  ;;  %v1313_v60 = vpop.f32.mrb[5].mxu0 }
 0x2ea   : > { %v832_v61 = vpop.f32.mrb[6].mxu0 }
 0x2eb   : > { %v835_v62 = vpack.c.bf16 %v830_v59, %v830_v59  ;;  %v1314_v63 = vpop.f32.mrb[7].mxu0 }
 0x2ed   : > { %1332 = vmatmul.mubr.bf16.vlgmr.msra.gmra.mrb[4].mxu1 %v835_v62 }
 0x2ee   : > { %1772 = shalt.err (!%p1769_p10)
}
 0x2ef   : > { %s1773_s20 = scalar_lea.hbm %s2321_s25, 128  ;;  %s1777_s12 = scalar_lea.hbm %s2430_s18, 256 }
 0x2f0   : > { %p1774_p11 = scmp.ne.s32.totalorder %s2321_s25, %s1773_s20  ;;  %p1778_p7 = scmp.lt.u32.totalorder %s2321_s25, %s2430_s18 }
 0x2f1   : > { %p1779_p6 = scmp.lt.u32.totalorder %s1777_s12, %s1773_s20  ;;  %p1781_p12 = scmp.lt.u32.totalorder %s1773_s20, %s2321_s25 }
 0x2f2   : > { %p1775_p8 = pnand %p1774_p11, %p2431_p1 }
 0x2f3   : > { %p1780_p9 = por %p1779_p6, %p1778_p7 }
 0x2f4   : > { %p1776_p5 = pneg %p1775_p8 }
 0x2f5   : > { %p1782_p13 = por %p1781_p12, %p1780_p9 }
 0x2f7   : > { %p1783_p0 = pnand %p1782_p13, %p1776_p5 }
 0x2f9   : > { %1786 = shalt.err (!%p1783_p0)
}
 0x2fa   : > { %1369 = dma.vmem_to_hbm [thread:$0]  (%p2431_p1), %s964_s21, 128, %s2321_s25, %s945_s22   ;;  %v852_v0 = vld [vmem:[#allocation16] sm:$0x1]  ;;  %vm941_vm1 = vcmask 1040384  }
 0x2fb   : > { %s493_s30 = scalar_lea.vmem [#allocation18], %s2248_s17  ;;  %s2432_s26 = sshll.u32 %s1966_s19, 7 }
 0x2fc   : > { %s976_s10 = sshll.u32 %s493_s30, 4  ;;  %s2433_s11 = sld [smem:[#allocation29_spill]]  ;;  %s2349_s10 = int_to_ptr.vmem [resolvable:$true] %s976_s10 }
 0x2fd   : > { %s950_s17 = scalar_lea.sflag [#allocation19], %s2245_s29  ;;  %s1787_s21 = scalar_lea.vmem %s2349_s10, 128 }
 0x2fe   : > { %p1788_p2 = scmp.ne.s32.totalorder %s2349_s10, %s1787_s21  ;;  %s1889_s19 = smov [#allocation18]  }
 0x2ff   : > { %s1791_s25 = sshll.u32 %s1889_s19, 4  ;;  %s1792_s25 = int_to_ptr.vmem [resolvable:$false] %s1791_s25 }
 0x300   : > { %p1789_p3 = pnand %p1788_p2, %p2431_p1  ;;  %s1793_s22 = scalar_lea.vmem %s1792_s25, 256 }
 0x301   : > { %p1794_p10 = scmp.lt.s32.totalorder %s2349_s10, %s1792_s25  ;;  %p1795_p11 = scmp.lt.s32.totalorder %s1793_s22, %s1787_s21 }
 0x302   : > { %s2347_s12 = scalar_lea.hbm %s2433_s11, %s2432_s26  ;;  %p1790_p4 = pneg %p1789_p3 }
 0x303   : > { %p1796_p8 = por %p1795_p11, %p1794_p10 }
 0x305   : > { %p1797_p5 = pnand %p1796_p8, %p1790_p4 }
 0x3c0   : > { %v935_v1 = vpop.f32.mrb[4].mxu1 }
 0x3c1   : > { %v936_v2 = vadd.f32 %v935_v1, %v852_v0  ;;  %v1333_v3 = vpop.f32.mrb[5].mxu1 }
 0x3c2   : > { %v938_v4 = vpop.f32.mrb[6].mxu1 }
 0x3c3   : > { %v942_v5 = vsel %vm941_vm1, %v936_v2, 0.0  ;;  %v1334_v6 = vpop.f32.mrb[7].mxu1 }
 0x3c4   : > { %943 = vst [vmem:[%s493_s30] sm:$0xff] %v942_v5 }
 0x3c5   : > { %1800 = shalt.err (!%p1797_p5)
}
 0x3c6   : > { %s1801_s29 = scalar_lea.hbm %s2347_s12, 128  ;;  %s1805_s26 = scalar_lea.hbm %s2433_s11, 256 }
 0x3c7   : > { %p1802_p7 = scmp.ne.s32.totalorder %s2347_s12, %s1801_s29  ;;  %p1806_p12 = scmp.lt.u32.totalorder %s2347_s12, %s2433_s11 }
 0x3c8   : > { %p1807_p13 = scmp.lt.u32.totalorder %s1805_s26, %s1801_s29  ;;  %p1809_p2 = scmp.lt.u32.totalorder %s1801_s29, %s2347_s12 }
 0x3c9   : > { %p1803_p6 = pnand %p1802_p7, %p2431_p1 }
 0x3ca   : > { %p1808_p0 = por %p1807_p13, %p1806_p12 }
 0x3cb   : > { %p1804_p9 = pneg %p1803_p6 }
 0x3cc   : > { %p1810_p3 = por %p1809_p2, %p1808_p0 }
 0x3ce   : > { %p1811_p4 = pnand %p1810_p3, %p1804_p9 }
 0x3d0   : > { %1814 = shalt.err (!%p1811_p4)
}
 0x3d1   : > { %1370 = dma.vmem_to_hbm [thread:$0]  (%p2431_p1), %s2349_s10, 128, %s2347_s12, %s950_s17  }
 0x3d2 PF: > { %s988_s21 = sand.u32 1, %s1861_s13   ;;  %p2434_p10 = scmp.ne.s32.totalorder %s2419_s28, 0 }
 0x3d3   : > { %p2435_p11 = scmp.ge.s32.totalorder %s1873_s16, 2  ;;  %s989_s19 = scalar_lea.sflag [#allocation4], %s988_s21 }
 0x3d5   : > { %p1403_p8 = pnand %p2435_p11, %p2434_p10 }
 0x3d7   : > { %1852 = dma.done.wait (!%p1403_p8), %s989_s19, 128  }
 0x3d8   : > { %1854 = vsyncadd (!%p1403_p8), %s989_s19, 4294967168  ;;  %s998_s25 = scalar_lea.sflag [#allocation19], %s988_s21 }
 0x3d9   : > { %1856 = dma.done.wait (!%p1403_p8), %s998_s25, 128  }
 0x3da   : > { %1858 = vsyncadd (!%p1403_p8), %s998_s25, 4294967168  ;;  %p31_p1 = scmp.ge.s32.totalorder %s2169_s23, 4   ;;  %s2436_s13 = smov %s1865_s14 }
 0x3db   : > { %s2437_s14 = smov %s1869_s15  ;;  %s2438_s15 = smov %s2180_s24 }
 0x3dc   : > { %s2439_s16 = smov %s2169_s23  ;;  %33 = sbr.rel (!%p31_p1) target bundleno = 15 (0xf), region = 150 }
 0x3e3   :  { %1003 = vsyncpa [#allocation3], 1 }
 0x3e4   :  { %1005 = vsyncpa [#allocation3 + $0x1], 1 }
 0x3e5   :  { %1006 = vsyncpa [#allocation6], 1 }
 0x3e6   :  { %1007 = vsyncpa [#allocation9], 1 }
 0x3e7   :  { %1008 = vsyncpa [#allocation12], 1 }
 0x3e8   :  { %1009 = vsyncpa [#allocation15], 1 }
 0x3e9   :  { %1010 = vsyncpa [#allocation4], 1 }
 0x3ea   :  { %1012 = vsyncpa [#allocation4 + $0x1], 1 }
 0x3eb   :  { %1013 = vsyncpa [#allocation19], 1 }
 0x3ec   :  { %1015 = vsyncpa [#allocation19 + $0x1], 1 }

</bundles_post_ra>
